<compile_context>
chip_gen: v7x
topology: tpu7x:2x2x1
jax: 0.10.0
libtpu: 0.0.40
codegen_flags: <defaults>
</compile_context>

<pallas_src>
import functools
import math

import numpy as np
import jax
import jax.numpy as jnp
from jax import lax
from jax.experimental import pallas as pl
from jax.experimental.pallas import tpu as pltpu

# ---- hyper-parameters: SimpleViT2(classes=3, depth=2, heads=2, mlp_dim=32,
#      dim_head=8); dim is hard-coded to 20 in the module ----
DIM = 20
DEPTH = 2
HEADS = 2
DIM_HEAD = 8
INNER = HEADS * DIM_HEAD
MLP_DIM = 32
CLASSES = 3
CONV_K = 19
CONV_PAD = 5
CONV_STRIDE = 3
LN_EPS = 1e-5
BN_EPS = 1e-5
ATTN_SCALE = DIM_HEAD ** -0.5


# ----------------------------- shared math ---------------------------------
def _layernorm(x, g, b):
    mu = jnp.mean(x, axis=-1, keepdims=True)
    var = jnp.mean(jnp.square(x - mu), axis=-1, keepdims=True)
    return (x - mu) * lax.rsqrt(var + LN_EPS) * g + b


def _gelu_exact(x):
    # nn.GELU() default = exact erf formulation
    return 0.5 * x * (1.0 + lax.erf(x * 0.7071067811865476))


def posemb_sincos_1d(length, dim, dtype=jnp.float32):
    if dim % 2 != 0:
        raise ValueError("Cannot use sin/cos positional encoding with odd dim")
    position = jnp.arange(length, dtype=jnp.float32)[:, None]
    div_term = jnp.exp(
        jnp.arange(0, dim, 2, dtype=jnp.float32) * (-math.log(10000.0) / dim))
    pe = jnp.zeros((length, dim), dtype=jnp.float32)
    pe = pe.at[:, 0::2].set(jnp.sin(position * div_term))
    pe = pe.at[:, 1::2].set(jnp.cos(position * div_term))
    return pe.astype(dtype)


# ----------------------------- fused Pallas kernel --------------------------
def fused_vit_kernel(patch_ref, wconv_ref, bconv_ref, pe_ref,
                     ln1_ref, wq_ref, wk_ref, wv_ref, wo_ref, ln2_ref,
                     w1_ref, b1_ref, w2_ref, b2_ref,
                     lnh_ref, wh_ref, bh_ref, out_ref,
                     *, depth, heads, bt, np_tokens):
    m_rows = bt * np_tokens
    inv_np = 1.0 / float(np_tokens)

    # ---- block-diagonal attention mask + per-sequence mean-pool matrix,
    #      generated in-kernel from iota.  floor((i + 0.5) / Np) is the
    #      sequence id of flattened row i; the +0.5 offset keeps the f32 floor
    #      exact (never lands near an integer boundary). ----
    def seq_id(shape, dim):
        idx = lax.broadcasted_iota(jnp.int32, shape, dim).astype(jnp.float32)
        return jnp.floor((idx + 0.5) * inv_np)

    attn_bias = jnp.where(
        seq_id((m_rows, m_rows), 0) == seq_id((m_rows, m_rows), 1), 0.0, -1e30)
    pool_row = lax.broadcasted_iota(jnp.int32, (bt, m_rows), 0).astype(jnp.float32)
    pool = jnp.where(pool_row == seq_id((bt, m_rows), 1), inv_np, 0.0)

    # ---- Conv1d + folded eval-BN + ReLU on both MaxPool taps ----
    # patch_ref: (2, M, K) -- tap a / tap b im2col patches, M = Bt*Np rows.
    w = wconv_ref[...]                                          # (K, D)
    b = bconv_ref[...]                                          # (1, D)
    ya = jnp.maximum(
        jnp.dot(patch_ref[0], w, preferred_element_type=jnp.float32) + b, 0.0)
    yb = jnp.maximum(
        jnp.dot(patch_ref[1], w, preferred_element_type=jnp.float32) + b, 0.0)
    # MaxPool1d(k=2,s=2,p=1) == max of the two taps; + sincos positional emb.
    x = jnp.maximum(ya, yb) + pe_ref[...]                       # (M, D)

    for l in range(depth):
        # ---------------- attention (pre-LN, residual) ----------------
        ln1 = ln1_ref[l]                                        # (2, D)
        h = _layernorm(x, ln1[0:1, :], ln1[1:2, :])
        acc = x                                                  # residual
        for hd in range(heads):
            lh = l * heads + hd
            # per-head projections: no lane slices of a fused qkv, no concat.
            q = jnp.dot(h, wq_ref[lh], preferred_element_type=jnp.float32)
            k = jnp.dot(h, wk_ref[lh], preferred_element_type=jnp.float32)
            v = jnp.dot(h, wv_ref[lh], preferred_element_type=jnp.float32)
            dots = lax.dot_general(q, k, (((1,), (1,)), ((), ())),
                                   preferred_element_type=jnp.float32)
            dots = dots + attn_bias                              # mask cross-batch
            m = jnp.max(dots, axis=-1, keepdims=True)
            e = jnp.exp(dots - m)
            inv = pl.reciprocal(jnp.sum(e, axis=-1, keepdims=True), approx=True)
            o = jnp.dot(e * inv, v, preferred_element_type=jnp.float32)  # (M, dh)
            # fold the output projection per head straight onto the residual
            acc = acc + jnp.dot(o, wo_ref[lh], preferred_element_type=jnp.float32)
        x = acc

        # ---------------- feed-forward (pre-LN, residual) ----------------
        ln2 = ln2_ref[l]
        h = _layernorm(x, ln2[0:1, :], ln2[1:2, :])
        h = jnp.dot(h, w1_ref[l], preferred_element_type=jnp.float32) + b1_ref[l]
        h = _gelu_exact(h)
        x = jnp.dot(h, w2_ref[l], preferred_element_type=jnp.float32) + b2_ref[l] + x

    # ---------------- head: per-sequence mean -> LN -> Linear ----------------
    pooled = jnp.dot(pool, x, preferred_element_type=jnp.float32)   # (Bt, D)
    lnh = lnh_ref[...]
    hh = _layernorm(pooled, lnh[0:1, :], lnh[1:2, :])
    # TODO(synk): CLASSES=3 lanes -> masked vst on the writeback; negligible
    # bytes here so not padded to 128 lanes.
    out_ref[...] = jnp.dot(hh, wh_ref[...],
                           preferred_element_type=jnp.float32) + bh_ref[...]


# ----------------------------- full forward (Pallas) ------------------------
def _pick_block(batch, block_batch):
    """Bt sequences per grid step.  Single full-extent block for small batches;
    otherwise a multiple of 8 so every (Bt, .) / (Bt*Np, .) block shape
    satisfies the (8,128) sublane rule.  Sweep block_batch in {8,16,32}."""
    if batch <= block_batch:
        return batch, 1
    bt = max(8, (block_batch // 8) * 8)
    return bt, -(-batch // bt)


def forward_pallas(params, inputs, block_batch=16):
    B, _, L = inputs.shape
    Nc = (L + 2 * CONV_PAD - CONV_K) // CONV_STRIDE + 1      # conv output length
    Np = Nc // 2 + 1                                          # pool output length

    Bt, n_blocks = _pick_block(B, block_batch)
    B_pad = n_blocks * Bt
    M = Bt * Np
    # defensive (8,128)-rule guard: multi-block tiles must be multiples of 8.
    assert n_blocks == 1 or (Bt % 8 == 0 and M % 8 == 0), (Bt, M, n_blocks)

    # ---- glue: im2col patches for Conv1d(1, 20, k=19, pad=5, stride=3) ----
    xs = inputs[:, 0, :]
    xpad = jnp.pad(xs, ((0, 0), (CONV_PAD, CONV_PAD)))
    conv_idx = np.arange(Nc)[:, None] * CONV_STRIDE + np.arange(CONV_K)[None, :]
    patches = xpad[:, conv_idx]                               # (B, Nc, K)
    if B_pad > B:
        patches = jnp.pad(patches, ((0, B_pad - B), (0, 0), (0, 0)))

    # ---- glue: the two MaxPool taps per token. Invalid taps (the -inf pads in
    #      PyTorch) duplicate the valid tap so the in-kernel max is exact.
    #      NOTE: 2*Np == Nc+1, so this slab duplicates only one conv row per
    #      sequence (~5%), keeping the gather-free layout essentially free. ----
    pos_a = np.maximum(2 * np.arange(Np) - 1, 0)
    pos_b = np.minimum(2 * np.arange(Np), Nc - 1)
    pa = patches[:, pos_a, :].reshape(B_pad * Np, CONV_K)
    pb = patches[:, pos_b, :].reshape(B_pad * Np, CONV_K)
    patches_ab = jnp.stack([pa, pb], axis=0)                  # (2, B_pad*Np, K)

    # ---- glue: fold eval-mode BatchNorm1d into the conv weight / bias ----
    inv_std = 1.0 / jnp.sqrt(params['bn_var'] + BN_EPS)
    scale = params['bn_g'] * inv_std
    w_eff = jnp.transpose(params['conv_w'][:, 0, :]) * scale[None, :]   # (K, D)
    b_eff = ((params['conv_b'] - params['bn_mean']) * scale
             + params['bn_b']).reshape(1, DIM)

    # positional embedding tiled over the Bt sequences of a block
    pe_tiled = jnp.tile(posemb_sincos_1d(Np, DIM), (Bt, 1))             # (M, D)

    # ---- per-head weight slabs, (DEPTH*HEADS, ...); ATTN_SCALE folded into Q ----
    layers = params['layers']

    def per_head_cols(wqkv, off):
        # columns [off : off+INNER] -> (HEADS, DIM, DIM_HEAD)
        return wqkv[:, off:off + INNER].reshape(DIM, HEADS, DIM_HEAD).transpose(1, 0, 2)

    wq = jnp.concatenate([per_head_cols(lp['wqkv'], 0) for lp in layers], 0) * ATTN_SCALE
    wk = jnp.concatenate([per_head_cols(lp['wqkv'], INNER) for lp in layers], 0)
    wv = jnp.concatenate([per_head_cols(lp['wqkv'], 2 * INNER) for lp in layers], 0)
    wo = jnp.concatenate([lp['wout'].reshape(HEADS, DIM_HEAD, DIM) for lp in layers], 0)

    ln1 = jnp.stack([jnp.concatenate([lp['ln1_g'], lp['ln1_b']], 0) for lp in layers])
    ln2 = jnp.stack([jnp.concatenate([lp['ln2_g'], lp['ln2_b']], 0) for lp in layers])
    w1 = jnp.stack([lp['w1'] for lp in layers])
    b1 = jnp.stack([lp['b1'] for lp in layers])
    w2 = jnp.stack([lp['w2'] for lp in layers])
    b2 = jnp.stack([lp['b2'] for lp in layers])
    lnh = jnp.concatenate([params['lnh_g'], params['lnh_b']], axis=0)   # (2, D)

    kern = functools.partial(fused_vit_kernel, depth=DEPTH, heads=HEADS,
                             bt=Bt, np_tokens=Np)
    c2 = lambda i: (0, 0)
    c3 = lambda i: (0, 0, 0)

    out = pl.pallas_call(
        kern,
        out_shape=jax.ShapeDtypeStruct((B_pad, CLASSES), jnp.float32),
        grid=(n_blocks,),
        in_specs=[
            pl.BlockSpec((2, M, CONV_K), lambda i: (0, i, 0)),          # patches
            pl.BlockSpec((CONV_K, DIM), c2),                            # w_eff
            pl.BlockSpec((1, DIM), c2),                                 # b_eff
            pl.BlockSpec((M, DIM), c2),                                 # pe
            pl.BlockSpec((DEPTH, 2, DIM), c3),                          # ln1 g/b
            pl.BlockSpec((DEPTH * HEADS, DIM, DIM_HEAD), c3),           # wq (scaled)
            pl.BlockSpec((DEPTH * HEADS, DIM, DIM_HEAD), c3),           # wk
            pl.BlockSpec((DEPTH * HEADS, DIM, DIM_HEAD), c3),           # wv
            pl.BlockSpec((DEPTH * HEADS, DIM_HEAD, DIM), c3),           # wo
            pl.BlockSpec((DEPTH, 2, DIM), c3),                          # ln2 g/b
            pl.BlockSpec((DEPTH, DIM, MLP_DIM), c3),                    # w1
            pl.BlockSpec((DEPTH, 1, MLP_DIM), c3),                      # b1
            pl.BlockSpec((DEPTH, MLP_DIM, DIM), c3),                    # w2
            pl.BlockSpec((DEPTH, 1, DIM), c3),                          # b2
            pl.BlockSpec((2, DIM), c2),                                 # head LN g/b
            pl.BlockSpec((DIM, CLASSES), c2),                           # wh
            pl.BlockSpec((1, CLASSES), c2),                             # bh
        ],
        out_specs=pl.BlockSpec((Bt, CLASSES), lambda i: (i, 0)),
        compiler_params=pltpu.CompilerParams(
            dimension_semantics=("parallel",)),
    )(patches_ab, w_eff, b_eff, pe_tiled,
      ln1, wq, wk, wv, wo, ln2, w1, b1, w2, b2, lnh, params['wh'], params['bh'])
    return out[:B]


# ----------------------------- pure-JAX reference ---------------------------
def forward_ref(params, inputs):
    B, _, L = inputs.shape
    xs = inputs[:, 0, :]
    xpad = jnp.pad(xs, ((0, 0), (CONV_PAD, CONV_PAD)))
    Nc = (L + 2 * CONV_PAD - CONV_K) // CONV_STRIDE + 1
    idx = np.arange(Nc)[:, None] * CONV_STRIDE + np.arange(CONV_K)[None, :]
    patches = xpad[:, idx]
    w = jnp.transpose(params['conv_w'][:, 0, :])
    y = patches @ w + params['conv_b']
    y = (y - params['bn_mean']) / jnp.sqrt(params['bn_var'] + BN_EPS) \
        * params['bn_g'] + params['bn_b']
    y = jnp.maximum(y, 0.0)
    Np = Nc // 2 + 1
    pad_r = 2 * Np - Nc - 1
    y = jnp.pad(y, ((0, 0), (1, pad_r), (0, 0)), constant_values=-jnp.inf)
    x = jnp.max(y.reshape(B, Np, 2, DIM), axis=2)
    x = x + posemb_sincos_1d(Np, DIM)
    for lp in params['layers']:
        h = _layernorm(x, lp['ln1_g'][0], lp['ln1_b'][0])
        qkv = h @ lp['wqkv']
        q, k, v = jnp.split(qkv, 3, axis=-1)
        sh = lambda t: t.reshape(B, Np, HEADS, DIM_HEAD).transpose(0, 2, 1, 3)
        q, k, v = sh(q), sh(k), sh(v)
        dots = jnp.einsum('bhnd,bhmd->bhnm', q, k) * ATTN_SCALE
        m = jnp.max(dots, axis=-1, keepdims=True)
        e = jnp.exp(dots - m)
        attn = e / jnp.sum(e, axis=-1, keepdims=True)
        out = jnp.einsum('bhnm,bhmd->bhnd', attn, v)
        out = out.transpose(0, 2, 1, 3).reshape(B, Np, INNER)
        x = out @ lp['wout'] + x
        h = _layernorm(x, lp['ln2_g'][0], lp['ln2_b'][0])
        h = _gelu_exact(h @ lp['w1'] + lp['b1'][0])
        x = h @ lp['w2'] + lp['b2'][0] + x
    x = jnp.mean(x, axis=1)
    h = _layernorm(x, params['lnh_g'][0], params['lnh_b'][0])
    return h @ params['wh'] + params['bh'][0]


# ----------------------------- deterministic init ---------------------------
def init_params(key):
    keys = iter(jax.random.split(key, 64))
    nk = lambda: next(keys)
    nrm = lambda k, shape, s: s * jax.random.normal(k, shape, dtype=jnp.float32)
    params = {
        'conv_w': nrm(nk(), (DIM, 1, CONV_K), 0.2),
        'conv_b': nrm(nk(), (DIM,), 0.1),
        'bn_g': 1.0 + nrm(nk(), (DIM,), 0.1),
        'bn_b': nrm(nk(), (DIM,), 0.1),
        'bn_mean': nrm(nk(), (DIM,), 0.1),
        'bn_var': 1.0 + jnp.abs(nrm(nk(), (DIM,), 0.1)),
        'lnh_g': 1.0 + nrm(nk(), (1, DIM), 0.1),
        'lnh_b': nrm(nk(), (1, DIM), 0.1),
        'wh': nrm(nk(), (DIM, CLASSES), 0.2),
        'bh': nrm(nk(), (1, CLASSES), 0.1),
        'layers': [],
    }
    for _ in range(DEPTH):
        params['layers'].append({
            'ln1_g': 1.0 + nrm(nk(), (1, DIM), 0.1),
            'ln1_b': nrm(nk(), (1, DIM), 0.1),
            'wqkv': nrm(nk(), (DIM, 3 * INNER), 0.2),
            'wout': nrm(nk(), (INNER, DIM), 0.2),
            'ln2_g': 1.0 + nrm(nk(), (1, DIM), 0.1),
            'ln2_b': nrm(nk(), (1, DIM), 0.1),
            'w1': nrm(nk(), (DIM, MLP_DIM), 0.2),
            'b1': nrm(nk(), (1, MLP_DIM), 0.1),
            'w2': nrm(nk(), (MLP_DIM, DIM), 0.2),
            'b2': nrm(nk(), (1, DIM), 0.1),
        })
    return params


# ----------------------------- main ------------------------------------------
if __name__ == "__main__":
    key = jax.random.PRNGKey(0)
    pkey, xkey = jax.random.split(key)
    params = init_params(pkey)

    fwd = jax.jit(forward_pallas)

    # small demo batch (single grid block, full-extent tiles): (B, 1, L)
    B, L = 2, 64
    x = jax.random.normal(xkey, (B, 1, L), dtype=jnp.float32)
    out = jax.block_until_ready(fwd(params, x))                 # (B, CLASSES)
    np.testing.assert_allclose(np.asarray(out), np.asarray(forward_ref(params, x)),
                               rtol=2e-3, atol=2e-3)

    # larger batch exercising the tuned multi-block path: Bt=16 -> M=160 rows
    # per step, 2 "parallel" grid steps (both v7x TensorCores busy).
    B2 = 20
    x2 = jax.random.normal(jax.random.PRNGKey(1), (B2, 1, L), dtype=jnp.float32)
    out2 = jax.block_until_ready(fwd(params, x2))
    np.testing.assert_allclose(np.asarray(out2), np.asarray(forward_ref(params, x2)),
                               rtol=2e-3, atol=2e-3)

    print("KERNEL_OK")
</pallas_src>

<mosaic_0001>
module attributes {stable_mosaic.version = 11 : i64} {
  func.func @fused_vit_kernel(%arg0: i32, %arg1: memref<2x20x19xf32, #tpu.memory_space<vmem>>, %arg2: memref<19x20xf32, #tpu.memory_space<vmem>>, %arg3: memref<1x20xf32, #tpu.memory_space<vmem>>, %arg4: memref<20x20xf32, #tpu.memory_space<vmem>>, %arg5: memref<2x2x20xf32, #tpu.memory_space<vmem>>, %arg6: memref<4x20x8xf32, #tpu.memory_space<vmem>>, %arg7: memref<4x20x8xf32, #tpu.memory_space<vmem>>, %arg8: memref<4x20x8xf32, #tpu.memory_space<vmem>>, %arg9: memref<4x8x20xf32, #tpu.memory_space<vmem>>, %arg10: memref<2x2x20xf32, #tpu.memory_space<vmem>>, %arg11: memref<2x20x32xf32, #tpu.memory_space<vmem>>, %arg12: memref<2x1x32xf32, #tpu.memory_space<vmem>>, %arg13: memref<2x32x20xf32, #tpu.memory_space<vmem>>, %arg14: memref<2x1x20xf32, #tpu.memory_space<vmem>>, %arg15: memref<2x20xf32, #tpu.memory_space<vmem>>, %arg16: memref<20x3xf32, #tpu.memory_space<vmem>>, %arg17: memref<1x3xf32, #tpu.memory_space<vmem>>, %arg18: memref<2x3xf32, #tpu.memory_space<vmem>>) attributes {dimension_semantics = [#tpu.dimension_semantics<parallel>], iteration_bounds = array<i64: 1>, scalar_prefetch = 0 : i64, scratch_operands = 0 : i64, tpu.core_type = #tpu.core_type<tc>, window_params = [{transform_indices = @transform_0, window_bounds = array<i64: 2, 20, 19>}, {pipeline_mode = #tpu.pipeline_mode<synchronous>, transform_indices = @transform_1, window_bounds = array<i64: 19, 20>}, {pipeline_mode = #tpu.pipeline_mode<synchronous>, transform_indices = @transform_2, window_bounds = array<i64: 1, 20>}, {pipeline_mode = #tpu.pipeline_mode<synchronous>, transform_indices = @transform_3, window_bounds = array<i64: 20, 20>}, {pipeline_mode = #tpu.pipeline_mode<synchronous>, transform_indices = @transform_4, window_bounds = array<i64: 2, 2, 20>}, {pipeline_mode = #tpu.pipeline_mode<synchronous>, transform_indices = @transform_5, window_bounds = array<i64: 4, 20, 8>}, {pipeline_mode = #tpu.pipeline_mode<synchronous>, transform_indices = @transform_6, window_bounds = array<i64: 4, 20, 8>}, {pipeline_mode = #tpu.pipeline_mode<synchronous>, transform_indices = @transform_7, window_bounds = array<i64: 4, 20, 8>}, {pipeline_mode = #tpu.pipeline_mode<synchronous>, transform_indices = @transform_8, window_bounds = array<i64: 4, 8, 20>}, {pipeline_mode = #tpu.pipeline_mode<synchronous>, transform_indices = @transform_9, window_bounds = array<i64: 2, 2, 20>}, {pipeline_mode = #tpu.pipeline_mode<synchronous>, transform_indices = @transform_10, window_bounds = array<i64: 2, 20, 32>}, {pipeline_mode = #tpu.pipeline_mode<synchronous>, transform_indices = @transform_11, window_bounds = array<i64: 2, 1, 32>}, {pipeline_mode = #tpu.pipeline_mode<synchronous>, transform_indices = @transform_12, window_bounds = array<i64: 2, 32, 20>}, {pipeline_mode = #tpu.pipeline_mode<synchronous>, transform_indices = @transform_13, window_bounds = array<i64: 2, 1, 20>}, {pipeline_mode = #tpu.pipeline_mode<synchronous>, transform_indices = @transform_14, window_bounds = array<i64: 2, 20>}, {pipeline_mode = #tpu.pipeline_mode<synchronous>, transform_indices = @transform_15, window_bounds = array<i64: 20, 3>}, {pipeline_mode = #tpu.pipeline_mode<synchronous>, transform_indices = @transform_16, window_bounds = array<i64: 1, 3>}, {transform_indices = @transform_17, window_bounds = array<i64: 2, 3>}]} {
    %0 = tpu.iota {dimensions = array<i32: 0>} : vector<20x20xi32>
    %1 = arith.sitofp %0 : vector<20x20xi32> to vector<20x20xf32>
    %cst = arith.constant 5.000000e-01 : f32
    %2 = vector.broadcast %cst : f32 to vector<20x20xf32>
    %3 = arith.addf %1, %2 : vector<20x20xf32>
    %cst_0 = arith.constant 1.000000e-01 : f32
    %4 = vector.broadcast %cst_0 : f32 to vector<20x20xf32>
    %5 = arith.mulf %3, %4 : vector<20x20xf32>
    %6 = math.floor %5 : vector<20x20xf32>
    %7 = tpu.iota {dimensions = array<i32: 1>} : vector<20x20xi32>
    %8 = arith.sitofp %7 : vector<20x20xi32> to vector<20x20xf32>
    %cst_1 = arith.constant 5.000000e-01 : f32
    %9 = vector.broadcast %cst_1 : f32 to vector<20x20xf32>
    %10 = arith.addf %8, %9 : vector<20x20xf32>
    %cst_2 = arith.constant 1.000000e-01 : f32
    %11 = vector.broadcast %cst_2 : f32 to vector<20x20xf32>
    %12 = arith.mulf %10, %11 : vector<20x20xf32>
    %13 = math.floor %12 : vector<20x20xf32>
    %14 = arith.cmpf oeq, %6, %13 : vector<20x20xf32>
    %cst_3 = arith.constant 0.000000e+00 : f32
    %cst_4 = arith.constant -1.000000e+30 : f32
    %15 = vector.broadcast %cst_3 : f32 to vector<20x20xf32>
    %16 = vector.broadcast %cst_4 : f32 to vector<20x20xf32>
    %17 = arith.select %14, %15, %16 : vector<20x20xi1>, vector<20x20xf32>
    %18 = tpu.iota {dimensions = array<i32: 0>} : vector<2x20xi32>
    %19 = arith.sitofp %18 : vector<2x20xi32> to vector<2x20xf32>
    %20 = tpu.iota {dimensions = array<i32: 1>} : vector<2x20xi32>
    %21 = arith.sitofp %20 : vector<2x20xi32> to vector<2x20xf32>
    %cst_5 = arith.constant 5.000000e-01 : f32
    %22 = vector.broadcast %cst_5 : f32 to vector<2x20xf32>
    %23 = arith.addf %21, %22 : vector<2x20xf32>
    %cst_6 = arith.constant 1.000000e-01 : f32
    %24 = vector.broadcast %cst_6 : f32 to vector<2x20xf32>
    %25 = arith.mulf %23, %24 : vector<2x20xf32>
    %26 = math.floor %25 : vector<2x20xf32>
    %27 = arith.cmpf oeq, %19, %26 : vector<2x20xf32>
    %cst_7 = arith.constant 1.000000e-01 : f32
    %cst_8 = arith.constant 0.000000e+00 : f32
    %28 = vector.broadcast %cst_7 : f32 to vector<2x20xf32>
    %29 = vector.broadcast %cst_8 : f32 to vector<2x20xf32>
    %30 = arith.select %27, %28, %29 : vector<2x20xi1>, vector<2x20xf32>
    %c0 = arith.constant 0 : index
    %c0_9 = arith.constant 0 : index
    %31 = vector.load %arg2[%c0, %c0_9] : memref<19x20xf32, #tpu.memory_space<vmem>>, vector<19x20xf32>
    %c0_10 = arith.constant 0 : index
    %c0_11 = arith.constant 0 : index
    %32 = vector.load %arg3[%c0_10, %c0_11] : memref<1x20xf32, #tpu.memory_space<vmem>>, vector<1x20xf32>
    %c0_12 = arith.constant 0 : index
    %c0_13 = arith.constant 0 : index
    %c0_14 = arith.constant 0 : index
    %33 = vector.load %arg1[%c0_12, %c0_13, %c0_14] : memref<2x20x19xf32, #tpu.memory_space<vmem>>, vector<1x20x19xf32>
    %34 = vector.shape_cast %33 : vector<1x20x19xf32> to vector<20x19xf32>
    %cst_15 = arith.constant dense<0.000000e+00> : vector<20x20xf32>
    %35 = tpu.matmul %34, %31, %cst_15 {dimension_numbers = #tpu.dot_dimension_numbers<[1], [0], [0], [1], [0, 0, 1, 1], [], []>} : vector<20x19xf32>, vector<19x20xf32>, vector<20x20xf32> -> vector<20x20xf32>
    %36 = vector.broadcast %32 : vector<1x20xf32> to vector<20x20xf32>
    %37 = arith.addf %35, %36 : vector<20x20xf32>
    %cst_16 = arith.constant 0.000000e+00 : f32
    %38 = vector.broadcast %cst_16 : f32 to vector<20x20xf32>
    %39 = arith.maximumf %37, %38 : vector<20x20xf32>
    %c1 = arith.constant 1 : index
    %c0_17 = arith.constant 0 : index
    %c0_18 = arith.constant 0 : index
    %40 = vector.load %arg1[%c1, %c0_17, %c0_18] : memref<2x20x19xf32, #tpu.memory_space<vmem>>, vector<1x20x19xf32>
    %41 = vector.shape_cast %40 : vector<1x20x19xf32> to vector<20x19xf32>
    %cst_19 = arith.constant dense<0.000000e+00> : vector<20x20xf32>
    %42 = tpu.matmul %41, %31, %cst_19 {dimension_numbers = #tpu.dot_dimension_numbers<[1], [0], [0], [1], [0, 0, 1, 1], [], []>} : vector<20x19xf32>, vector<19x20xf32>, vector<20x20xf32> -> vector<20x20xf32>
    %43 = vector.broadcast %32 : vector<1x20xf32> to vector<20x20xf32>
    %44 = arith.addf %42, %43 : vector<20x20xf32>
    %cst_20 = arith.constant 0.000000e+00 : f32
    %45 = vector.broadcast %cst_20 : f32 to vector<20x20xf32>
    %46 = arith.maximumf %44, %45 : vector<20x20xf32>
    %47 = arith.maximumf %39, %46 : vector<20x20xf32>
    %c0_21 = arith.constant 0 : index
    %c0_22 = arith.constant 0 : index
    %48 = vector.load %arg4[%c0_21, %c0_22] : memref<20x20xf32, #tpu.memory_space<vmem>>, vector<20x20xf32>
    %49 = arith.addf %47, %48 : vector<20x20xf32>
    %c0_23 = arith.constant 0 : index
    %c0_24 = arith.constant 0 : index
    %c0_25 = arith.constant 0 : index
    %50 = vector.load %arg5[%c0_23, %c0_24, %c0_25] : memref<2x2x20xf32, #tpu.memory_space<vmem>>, vector<1x2x20xf32>
    %51 = vector.shape_cast %50 : vector<1x2x20xf32> to vector<2x20xf32>
    %52 = vector.extract_strided_slice %51 {offsets = [0, 0], sizes = [1, 20], strides = [1, 1]} : vector<2x20xf32> to vector<1x20xf32>
    %53 = vector.extract_strided_slice %51 {offsets = [1, 0], sizes = [1, 20], strides = [1, 1]} : vector<2x20xf32> to vector<1x20xf32>
    %cst_26 = arith.constant dense<0.000000e+00> : vector<20xf32>
    %54 = vector.multi_reduction <add>, %49, %cst_26 [1] : vector<20x20xf32> to vector<20xf32>
    %55 = vector.shape_cast %54 : vector<20xf32> to vector<20x1xf32>
    %cst_27 = arith.constant 2.000000e+01 : f32
    %56 = vector.broadcast %cst_27 : f32 to vector<20x1xf32>
    %57 = arith.divf %55, %56 : vector<20x1xf32>
    %58 = vector.broadcast %57 : vector<20x1xf32> to vector<20x20xf32>
    %59 = arith.subf %49, %58 : vector<20x20xf32>
    %60 = arith.mulf %59, %59 : vector<20x20xf32>
    %cst_28 = arith.constant dense<0.000000e+00> : vector<20xf32>
    %61 = vector.multi_reduction <add>, %60, %cst_28 [1] : vector<20x20xf32> to vector<20xf32>
    %62 = vector.shape_cast %61 : vector<20xf32> to vector<20x1xf32>
    %cst_29 = arith.constant 2.000000e+01 : f32
    %63 = vector.broadcast %cst_29 : f32 to vector<20x1xf32>
    %64 = arith.divf %62, %63 : vector<20x1xf32>
    %65 = vector.broadcast %57 : vector<20x1xf32> to vector<20x20xf32>
    %66 = arith.subf %49, %65 : vector<20x20xf32>
    %cst_30 = arith.constant 9.99999974E-6 : f32
    %67 = vector.broadcast %cst_30 : f32 to vector<20x1xf32>
    %68 = arith.addf %64, %67 : vector<20x1xf32>
    %69 = math.rsqrt %68 : vector<20x1xf32>
    %70 = vector.broadcast %69 : vector<20x1xf32> to vector<20x20xf32>
    %71 = arith.mulf %66, %70 : vector<20x20xf32>
    %72 = vector.broadcast %52 : vector<1x20xf32> to vector<20x20xf32>
    %73 = arith.mulf %71, %72 : vector<20x20xf32>
    %74 = vector.broadcast %53 : vector<1x20xf32> to vector<20x20xf32>
    %75 = arith.addf %73, %74 : vector<20x20xf32>
    %c0_31 = arith.constant 0 : index
    %c0_32 = arith.constant 0 : index
    %c0_33 = arith.constant 0 : index
    %76 = vector.load %arg6[%c0_31, %c0_32, %c0_33] : memref<4x20x8xf32, #tpu.memory_space<vmem>>, vector<1x20x8xf32>
    %77 = vector.shape_cast %76 : vector<1x20x8xf32> to vector<20x8xf32>
    %cst_34 = arith.constant dense<0.000000e+00> : vector<20x8xf32>
    %78 = tpu.matmul %75, %77, %cst_34 {dimension_numbers = #tpu.dot_dimension_numbers<[1], [0], [0], [1], [0, 0, 1, 1], [], []>} : vector<20x20xf32>, vector<20x8xf32>, vector<20x8xf32> -> vector<20x8xf32>
    %c0_35 = arith.constant 0 : index
    %c0_36 = arith.constant 0 : index
    %c0_37 = arith.constant 0 : index
    %79 = vector.load %arg7[%c0_35, %c0_36, %c0_37] : memref<4x20x8xf32, #tpu.memory_space<vmem>>, vector<1x20x8xf32>
    %80 = vector.shape_cast %79 : vector<1x20x8xf32> to vector<20x8xf32>
    %cst_38 = arith.constant dense<0.000000e+00> : vector<20x8xf32>
    %81 = tpu.matmul %75, %80, %cst_38 {dimension_numbers = #tpu.dot_dimension_numbers<[1], [0], [0], [1], [0, 0, 1, 1], [], []>} : vector<20x20xf32>, vector<20x8xf32>, vector<20x8xf32> -> vector<20x8xf32>
    %c0_39 = arith.constant 0 : index
    %c0_40 = arith.constant 0 : index
    %c0_41 = arith.constant 0 : index
    %82 = vector.load %arg8[%c0_39, %c0_40, %c0_41] : memref<4x20x8xf32, #tpu.memory_space<vmem>>, vector<1x20x8xf32>
    %83 = vector.shape_cast %82 : vector<1x20x8xf32> to vector<20x8xf32>
    %cst_42 = arith.constant dense<0.000000e+00> : vector<20x8xf32>
    %84 = tpu.matmul %75, %83, %cst_42 {dimension_numbers = #tpu.dot_dimension_numbers<[1], [0], [0], [1], [0, 0, 1, 1], [], []>} : vector<20x20xf32>, vector<20x8xf32>, vector<20x8xf32> -> vector<20x8xf32>
    %cst_43 = arith.constant dense<0.000000e+00> : vector<20x20xf32>
    %85 = tpu.matmul %78, %81, %cst_43 {dimension_numbers = #tpu.dot_dimension_numbers<[1], [1], [0], [0], [0, 0, 1, 0], [], []>} : vector<20x8xf32>, vector<20x8xf32>, vector<20x20xf32> -> vector<20x20xf32>
    %86 = arith.addf %85, %17 : vector<20x20xf32>
    %cst_44 = arith.constant dense<0xFF800000> : vector<20xf32>
    %87 = vector.multi_reduction <maximumf>, %86, %cst_44 [1] : vector<20x20xf32> to vector<20xf32>
    %88 = vector.shape_cast %87 : vector<20xf32> to vector<20x1xf32>
    %89 = vector.broadcast %88 : vector<20x1xf32> to vector<20x20xf32>
    %90 = arith.subf %86, %89 : vector<20x20xf32>
    %91 = math.exp %90 : vector<20x20xf32>
    %cst_45 = arith.constant dense<0.000000e+00> : vector<20xf32>
    %92 = vector.multi_reduction <add>, %91, %cst_45 [1] : vector<20x20xf32> to vector<20xf32>
    %93 = vector.shape_cast %92 : vector<20xf32> to vector<20x1xf32>
    %94 = tpu.reciprocal %93 {approx = true} : vector<20x1xf32> -> vector<20x1xf32>
    %95 = vector.broadcast %94 : vector<20x1xf32> to vector<20x20xf32>
    %96 = arith.mulf %91, %95 : vector<20x20xf32>
    %cst_46 = arith.constant dense<0.000000e+00> : vector<20x8xf32>
    %97 = tpu.matmul %96, %84, %cst_46 {dimension_numbers = #tpu.dot_dimension_numbers<[1], [0], [0], [1], [0, 0, 1, 1], [], []>} : vector<20x20xf32>, vector<20x8xf32>, vector<20x8xf32> -> vector<20x8xf32>
    %c0_47 = arith.constant 0 : index
    %c0_48 = arith.constant 0 : index
    %c0_49 = arith.constant 0 : index
    %98 = vector.load %arg9[%c0_47, %c0_48, %c0_49] : memref<4x8x20xf32, #tpu.memory_space<vmem>>, vector<1x8x20xf32>
    %99 = vector.shape_cast %98 : vector<1x8x20xf32> to vector<8x20xf32>
    %cst_50 = arith.constant dense<0.000000e+00> : vector<20x20xf32>
    %100 = tpu.matmul %97, %99, %cst_50 {dimension_numbers = #tpu.dot_dimension_numbers<[1], [0], [0], [1], [0, 0, 1, 1], [], []>} : vector<20x8xf32>, vector<8x20xf32>, vector<20x20xf32> -> vector<20x20xf32>
    %101 = arith.addf %49, %100 : vector<20x20xf32>
    %c1_51 = arith.constant 1 : index
    %c0_52 = arith.constant 0 : index
    %c0_53 = arith.constant 0 : index
    %102 = vector.load %arg6[%c1_51, %c0_52, %c0_53] : memref<4x20x8xf32, #tpu.memory_space<vmem>>, vector<1x20x8xf32>
    %103 = vector.shape_cast %102 : vector<1x20x8xf32> to vector<20x8xf32>
    %cst_54 = arith.constant dense<0.000000e+00> : vector<20x8xf32>
    %104 = tpu.matmul %75, %103, %cst_54 {dimension_numbers = #tpu.dot_dimension_numbers<[1], [0], [0], [1], [0, 0, 1, 1], [], []>} : vector<20x20xf32>, vector<20x8xf32>, vector<20x8xf32> -> vector<20x8xf32>
    %c1_55 = arith.constant 1 : index
    %c0_56 = arith.constant 0 : index
    %c0_57 = arith.constant 0 : index
    %105 = vector.load %arg7[%c1_55, %c0_56, %c0_57] : memref<4x20x8xf32, #tpu.memory_space<vmem>>, vector<1x20x8xf32>
    %106 = vector.shape_cast %105 : vector<1x20x8xf32> to vector<20x8xf32>
    %cst_58 = arith.constant dense<0.000000e+00> : vector<20x8xf32>
    %107 = tpu.matmul %75, %106, %cst_58 {dimension_numbers = #tpu.dot_dimension_numbers<[1], [0], [0], [1], [0, 0, 1, 1], [], []>} : vector<20x20xf32>, vector<20x8xf32>, vector<20x8xf32> -> vector<20x8xf32>
    %c1_59 = arith.constant 1 : index
    %c0_60 = arith.constant 0 : index
    %c0_61 = arith.constant 0 : index
    %108 = vector.load %arg8[%c1_59, %c0_60, %c0_61] : memref<4x20x8xf32, #tpu.memory_space<vmem>>, vector<1x20x8xf32>
    %109 = vector.shape_cast %108 : vector<1x20x8xf32> to vector<20x8xf32>
    %cst_62 = arith.constant dense<0.000000e+00> : vector<20x8xf32>
    %110 = tpu.matmul %75, %109, %cst_62 {dimension_numbers = #tpu.dot_dimension_numbers<[1], [0], [0], [1], [0, 0, 1, 1], [], []>} : vector<20x20xf32>, vector<20x8xf32>, vector<20x8xf32> -> vector<20x8xf32>
    %cst_63 = arith.constant dense<0.000000e+00> : vector<20x20xf32>
    %111 = tpu.matmul %104, %107, %cst_63 {dimension_numbers = #tpu.dot_dimension_numbers<[1], [1], [0], [0], [0, 0, 1, 0], [], []>} : vector<20x8xf32>, vector<20x8xf32>, vector<20x20xf32> -> vector<20x20xf32>
    %112 = arith.addf %111, %17 : vector<20x20xf32>
    %cst_64 = arith.constant dense<0xFF800000> : vector<20xf32>
    %113 = vector.multi_reduction <maximumf>, %112, %cst_64 [1] : vector<20x20xf32> to vector<20xf32>
    %114 = vector.shape_cast %113 : vector<20xf32> to vector<20x1xf32>
    %115 = vector.broadcast %114 : vector<20x1xf32> to vector<20x20xf32>
    %116 = arith.subf %112, %115 : vector<20x20xf32>
    %117 = math.exp %116 : vector<20x20xf32>
    %cst_65 = arith.constant dense<0.000000e+00> : vector<20xf32>
    %118 = vector.multi_reduction <add>, %117, %cst_65 [1] : vector<20x20xf32> to vector<20xf32>
    %119 = vector.shape_cast %118 : vector<20xf32> to vector<20x1xf32>
    %120 = tpu.reciprocal %119 {approx = true} : vector<20x1xf32> -> vector<20x1xf32>
    %121 = vector.broadcast %120 : vector<20x1xf32> to vector<20x20xf32>
    %122 = arith.mulf %117, %121 : vector<20x20xf32>
    %cst_66 = arith.constant dense<0.000000e+00> : vector<20x8xf32>
    %123 = tpu.matmul %122, %110, %cst_66 {dimension_numbers = #tpu.dot_dimension_numbers<[1], [0], [0], [1], [0, 0, 1, 1], [], []>} : vector<20x20xf32>, vector<20x8xf32>, vector<20x8xf32> -> vector<20x8xf32>
    %c1_67 = arith.constant 1 : index
    %c0_68 = arith.constant 0 : index
    %c0_69 = arith.constant 0 : index
    %124 = vector.load %arg9[%c1_67, %c0_68, %c0_69] : memref<4x8x20xf32, #tpu.memory_space<vmem>>, vector<1x8x20xf32>
    %125 = vector.shape_cast %124 : vector<1x8x20xf32> to vector<8x20xf32>
    %cst_70 = arith.constant dense<0.000000e+00> : vector<20x20xf32>
    %126 = tpu.matmul %123, %125, %cst_70 {dimension_numbers = #tpu.dot_dimension_numbers<[1], [0], [0], [1], [0, 0, 1, 1], [], []>} : vector<20x8xf32>, vector<8x20xf32>, vector<20x20xf32> -> vector<20x20xf32>
    %127 = arith.addf %101, %126 : vector<20x20xf32>
    %c0_71 = arith.constant 0 : index
    %c0_72 = arith.constant 0 : index
    %c0_73 = arith.constant 0 : index
    %128 = vector.load %arg10[%c0_71, %c0_72, %c0_73] : memref<2x2x20xf32, #tpu.memory_space<vmem>>, vector<1x2x20xf32>
    %129 = vector.shape_cast %128 : vector<1x2x20xf32> to vector<2x20xf32>
    %130 = vector.extract_strided_slice %129 {offsets = [0, 0], sizes = [1, 20], strides = [1, 1]} : vector<2x20xf32> to vector<1x20xf32>
    %131 = vector.extract_strided_slice %129 {offsets = [1, 0], sizes = [1, 20], strides = [1, 1]} : vector<2x20xf32> to vector<1x20xf32>
    %cst_74 = arith.constant dense<0.000000e+00> : vector<20xf32>
    %132 = vector.multi_reduction <add>, %127, %cst_74 [1] : vector<20x20xf32> to vector<20xf32>
    %133 = vector.shape_cast %132 : vector<20xf32> to vector<20x1xf32>
    %cst_75 = arith.constant 2.000000e+01 : f32
    %134 = vector.broadcast %cst_75 : f32 to vector<20x1xf32>
    %135 = arith.divf %133, %134 : vector<20x1xf32>
    %136 = vector.broadcast %135 : vector<20x1xf32> to vector<20x20xf32>
    %137 = arith.subf %127, %136 : vector<20x20xf32>
    %138 = arith.mulf %137, %137 : vector<20x20xf32>
    %cst_76 = arith.constant dense<0.000000e+00> : vector<20xf32>
    %139 = vector.multi_reduction <add>, %138, %cst_76 [1] : vector<20x20xf32> to vector<20xf32>
    %140 = vector.shape_cast %139 : vector<20xf32> to vector<20x1xf32>
    %cst_77 = arith.constant 2.000000e+01 : f32
    %141 = vector.broadcast %cst_77 : f32 to vector<20x1xf32>
    %142 = arith.divf %140, %141 : vector<20x1xf32>
    %143 = vector.broadcast %135 : vector<20x1xf32> to vector<20x20xf32>
    %144 = arith.subf %127, %143 : vector<20x20xf32>
    %cst_78 = arith.constant 9.99999974E-6 : f32
    %145 = vector.broadcast %cst_78 : f32 to vector<20x1xf32>
    %146 = arith.addf %142, %145 : vector<20x1xf32>
    %147 = math.rsqrt %146 : vector<20x1xf32>
    %148 = vector.broadcast %147 : vector<20x1xf32> to vector<20x20xf32>
    %149 = arith.mulf %144, %148 : vector<20x20xf32>
    %150 = vector.broadcast %130 : vector<1x20xf32> to vector<20x20xf32>
    %151 = arith.mulf %149, %150 : vector<20x20xf32>
    %152 = vector.broadcast %131 : vector<1x20xf32> to vector<20x20xf32>
    %153 = arith.addf %151, %152 : vector<20x20xf32>
    %c0_79 = arith.constant 0 : index
    %c0_80 = arith.constant 0 : index
    %c0_81 = arith.constant 0 : index
    %154 = vector.load %arg11[%c0_79, %c0_80, %c0_81] : memref<2x20x32xf32, #tpu.memory_space<vmem>>, vector<1x20x32xf32>
    %155 = vector.shape_cast %154 : vector<1x20x32xf32> to vector<20x32xf32>
    %cst_82 = arith.constant dense<0.000000e+00> : vector<20x32xf32>
    %156 = tpu.matmul %153, %155, %cst_82 {dimension_numbers = #tpu.dot_dimension_numbers<[1], [0], [0], [1], [0, 0, 1, 1], [], []>} : vector<20x20xf32>, vector<20x32xf32>, vector<20x32xf32> -> vector<20x32xf32>
    %c0_83 = arith.constant 0 : index
    %c0_84 = arith.constant 0 : index
    %c0_85 = arith.constant 0 : index
    %157 = vector.load %arg12[%c0_83, %c0_84, %c0_85] : memref<2x1x32xf32, #tpu.memory_space<vmem>>, vector<1x1x32xf32>
    %158 = vector.shape_cast %157 : vector<1x1x32xf32> to vector<1x32xf32>
    %159 = vector.broadcast %158 : vector<1x32xf32> to vector<20x32xf32>
    %160 = arith.addf %156, %159 : vector<20x32xf32>
    %cst_86 = arith.constant 5.000000e-01 : f32
    %161 = vector.broadcast %cst_86 : f32 to vector<20x32xf32>
    %162 = arith.mulf %161, %160 : vector<20x32xf32>
    %cst_87 = arith.constant 0.707106769 : f32
    %163 = vector.broadcast %cst_87 : f32 to vector<20x32xf32>
    %164 = arith.mulf %160, %163 : vector<20x32xf32>
    %165 = math.erf %164 : vector<20x32xf32>
    %cst_88 = arith.constant 1.000000e+00 : f32
    %166 = vector.broadcast %cst_88 : f32 to vector<20x32xf32>
    %167 = arith.addf %166, %165 : vector<20x32xf32>
    %168 = arith.mulf %162, %167 : vector<20x32xf32>
    %c0_89 = arith.constant 0 : index
    %c0_90 = arith.constant 0 : index
    %c0_91 = arith.constant 0 : index
    %169 = vector.load %arg13[%c0_89, %c0_90, %c0_91] : memref<2x32x20xf32, #tpu.memory_space<vmem>>, vector<1x32x20xf32>
    %170 = vector.shape_cast %169 : vector<1x32x20xf32> to vector<32x20xf32>
    %cst_92 = arith.constant dense<0.000000e+00> : vector<20x20xf32>
    %171 = tpu.matmul %168, %170, %cst_92 {dimension_numbers = #tpu.dot_dimension_numbers<[1], [0], [0], [1], [0, 0, 1, 1], [], []>} : vector<20x32xf32>, vector<32x20xf32>, vector<20x20xf32> -> vector<20x20xf32>
    %c0_93 = arith.constant 0 : index
    %c0_94 = arith.constant 0 : index
    %c0_95 = arith.constant 0 : index
    %172 = vector.load %arg14[%c0_93, %c0_94, %c0_95] : memref<2x1x20xf32, #tpu.memory_space<vmem>>, vector<1x1x20xf32>
    %173 = vector.shape_cast %172 : vector<1x1x20xf32> to vector<1x20xf32>
    %174 = vector.broadcast %173 : vector<1x20xf32> to vector<20x20xf32>
    %175 = arith.addf %171, %174 : vector<20x20xf32>
    %176 = arith.addf %175, %127 : vector<20x20xf32>
    %c1_96 = arith.constant 1 : index
    %c0_97 = arith.constant 0 : index
    %c0_98 = arith.constant 0 : index
    %177 = vector.load %arg5[%c1_96, %c0_97, %c0_98] : memref<2x2x20xf32, #tpu.memory_space<vmem>>, vector<1x2x20xf32>
    %178 = vector.shape_cast %177 : vector<1x2x20xf32> to vector<2x20xf32>
    %179 = vector.extract_strided_slice %178 {offsets = [0, 0], sizes = [1, 20], strides = [1, 1]} : vector<2x20xf32> to vector<1x20xf32>
    %180 = vector.extract_strided_slice %178 {offsets = [1, 0], sizes = [1, 20], strides = [1, 1]} : vector<2x20xf32> to vector<1x20xf32>
    %cst_99 = arith.constant dense<0.000000e+00> : vector<20xf32>
    %181 = vector.multi_reduction <add>, %176, %cst_99 [1] : vector<20x20xf32> to vector<20xf32>
    %182 = vector.shape_cast %181 : vector<20xf32> to vector<20x1xf32>
    %cst_100 = arith.constant 2.000000e+01 : f32
    %183 = vector.broadcast %cst_100 : f32 to vector<20x1xf32>
    %184 = arith.divf %182, %183 : vector<20x1xf32>
    %185 = vector.broadcast %184 : vector<20x1xf32> to vector<20x20xf32>
    %186 = arith.subf %176, %185 : vector<20x20xf32>
    %187 = arith.mulf %186, %186 : vector<20x20xf32>
    %cst_101 = arith.constant dense<0.000000e+00> : vector<20xf32>
    %188 = vector.multi_reduction <add>, %187, %cst_101 [1] : vector<20x20xf32> to vector<20xf32>
    %189 = vector.shape_cast %188 : vector<20xf32> to vector<20x1xf32>
    %cst_102 = arith.constant 2.000000e+01 : f32
    %190 = vector.broadcast %cst_102 : f32 to vector<20x1xf32>
    %191 = arith.divf %189, %190 : vector<20x1xf32>
    %192 = vector.broadcast %184 : vector<20x1xf32> to vector<20x20xf32>
    %193 = arith.subf %176, %192 : vector<20x20xf32>
    %cst_103 = arith.constant 9.99999974E-6 : f32
    %194 = vector.broadcast %cst_103 : f32 to vector<20x1xf32>
    %195 = arith.addf %191, %194 : vector<20x1xf32>
    %196 = math.rsqrt %195 : vector<20x1xf32>
    %197 = vector.broadcast %196 : vector<20x1xf32> to vector<20x20xf32>
    %198 = arith.mulf %193, %197 : vector<20x20xf32>
    %199 = vector.broadcast %179 : vector<1x20xf32> to vector<20x20xf32>
    %200 = arith.mulf %198, %199 : vector<20x20xf32>
    %201 = vector.broadcast %180 : vector<1x20xf32> to vector<20x20xf32>
    %202 = arith.addf %200, %201 : vector<20x20xf32>
    %c2 = arith.constant 2 : index
    %c0_104 = arith.constant 0 : index
    %c0_105 = arith.constant 0 : index
    %203 = vector.load %arg6[%c2, %c0_104, %c0_105] : memref<4x20x8xf32, #tpu.memory_space<vmem>>, vector<1x20x8xf32>
    %204 = vector.shape_cast %203 : vector<1x20x8xf32> to vector<20x8xf32>
    %cst_106 = arith.constant dense<0.000000e+00> : vector<20x8xf32>
    %205 = tpu.matmul %202, %204, %cst_106 {dimension_numbers = #tpu.dot_dimension_numbers<[1], [0], [0], [1], [0, 0, 1, 1], [], []>} : vector<20x20xf32>, vector<20x8xf32>, vector<20x8xf32> -> vector<20x8xf32>
    %c2_107 = arith.constant 2 : index
    %c0_108 = arith.constant 0 : index
    %c0_109 = arith.constant 0 : index
    %206 = vector.load %arg7[%c2_107, %c0_108, %c0_109] : memref<4x20x8xf32, #tpu.memory_space<vmem>>, vector<1x20x8xf32>
    %207 = vector.shape_cast %206 : vector<1x20x8xf32> to vector<20x8xf32>
    %cst_110 = arith.constant dense<0.000000e+00> : vector<20x8xf32>
    %208 = tpu.matmul %202, %207, %cst_110 {dimension_numbers = #tpu.dot_dimension_numbers<[1], [0], [0], [1], [0, 0, 1, 1], [], []>} : vector<20x20xf32>, vector<20x8xf32>, vector<20x8xf32> -> vector<20x8xf32>
    %c2_111 = arith.constant 2 : index
    %c0_112 = arith.constant 0 : index
    %c0_113 = arith.constant 0 : index
    %209 = vector.load %arg8[%c2_111, %c0_112, %c0_113] : memref<4x20x8xf32, #tpu.memory_space<vmem>>, vector<1x20x8xf32>
    %210 = vector.shape_cast %209 : vector<1x20x8xf32> to vector<20x8xf32>
    %cst_114 = arith.constant dense<0.000000e+00> : vector<20x8xf32>
    %211 = tpu.matmul %202, %210, %cst_114 {dimension_numbers = #tpu.dot_dimension_numbers<[1], [0], [0], [1], [0, 0, 1, 1], [], []>} : vector<20x20xf32>, vector<20x8xf32>, vector<20x8xf32> -> vector<20x8xf32>
    %cst_115 = arith.constant dense<0.000000e+00> : vector<20x20xf32>
    %212 = tpu.matmul %205, %208, %cst_115 {dimension_numbers = #tpu.dot_dimension_numbers<[1], [1], [0], [0], [0, 0, 1, 0], [], []>} : vector<20x8xf32>, vector<20x8xf32>, vector<20x20xf32> -> vector<20x20xf32>
    %213 = arith.addf %212, %17 : vector<20x20xf32>
    %cst_116 = arith.constant dense<0xFF800000> : vector<20xf32>
    %214 = vector.multi_reduction <maximumf>, %213, %cst_116 [1] : vector<20x20xf32> to vector<20xf32>
    %215 = vector.shape_cast %214 : vector<20xf32> to vector<20x1xf32>
    %216 = vector.broadcast %215 : vector<20x1xf32> to vector<20x20xf32>
    %217 = arith.subf %213, %216 : vector<20x20xf32>
    %218 = math.exp %217 : vector<20x20xf32>
    %cst_117 = arith.constant dense<0.000000e+00> : vector<20xf32>
    %219 = vector.multi_reduction <add>, %218, %cst_117 [1] : vector<20x20xf32> to vector<20xf32>
    %220 = vector.shape_cast %219 : vector<20xf32> to vector<20x1xf32>
    %221 = tpu.reciprocal %220 {approx = true} : vector<20x1xf32> -> vector<20x1xf32>
    %222 = vector.broadcast %221 : vector<20x1xf32> to vector<20x20xf32>
    %223 = arith.mulf %218, %222 : vector<20x20xf32>
    %cst_118 = arith.constant dense<0.000000e+00> : vector<20x8xf32>
    %224 = tpu.matmul %223, %211, %cst_118 {dimension_numbers = #tpu.dot_dimension_numbers<[1], [0], [0], [1], [0, 0, 1, 1], [], []>} : vector<20x20xf32>, vector<20x8xf32>, vector<20x8xf32> -> vector<20x8xf32>
    %c2_119 = arith.constant 2 : index
    %c0_120 = arith.constant 0 : index
    %c0_121 = arith.constant 0 : index
    %225 = vector.load %arg9[%c2_119, %c0_120, %c0_121] : memref<4x8x20xf32, #tpu.memory_space<vmem>>, vector<1x8x20xf32>
    %226 = vector.shape_cast %225 : vector<1x8x20xf32> to vector<8x20xf32>
    %cst_122 = arith.constant dense<0.000000e+00> : vector<20x20xf32>
    %227 = tpu.matmul %224, %226, %cst_122 {dimension_numbers = #tpu.dot_dimension_numbers<[1], [0], [0], [1], [0, 0, 1, 1], [], []>} : vector<20x8xf32>, vector<8x20xf32>, vector<20x20xf32> -> vector<20x20xf32>
    %228 = arith.addf %176, %227 : vector<20x20xf32>
    %c3 = arith.constant 3 : index
    %c0_123 = arith.constant 0 : index
    %c0_124 = arith.constant 0 : index
    %229 = vector.load %arg6[%c3, %c0_123, %c0_124] : memref<4x20x8xf32, #tpu.memory_space<vmem>>, vector<1x20x8xf32>
    %230 = vector.shape_cast %229 : vector<1x20x8xf32> to vector<20x8xf32>
    %cst_125 = arith.constant dense<0.000000e+00> : vector<20x8xf32>
    %231 = tpu.matmul %202, %230, %cst_125 {dimension_numbers = #tpu.dot_dimension_numbers<[1], [0], [0], [1], [0, 0, 1, 1], [], []>} : vector<20x20xf32>, vector<20x8xf32>, vector<20x8xf32> -> vector<20x8xf32>
    %c3_126 = arith.constant 3 : index
    %c0_127 = arith.constant 0 : index
    %c0_128 = arith.constant 0 : index
    %232 = vector.load %arg7[%c3_126, %c0_127, %c0_128] : memref<4x20x8xf32, #tpu.memory_space<vmem>>, vector<1x20x8xf32>
    %233 = vector.shape_cast %232 : vector<1x20x8xf32> to vector<20x8xf32>
    %cst_129 = arith.constant dense<0.000000e+00> : vector<20x8xf32>
    %234 = tpu.matmul %202, %233, %cst_129 {dimension_numbers = #tpu.dot_dimension_numbers<[1], [0], [0], [1], [0, 0, 1, 1], [], []>} : vector<20x20xf32>, vector<20x8xf32>, vector<20x8xf32> -> vector<20x8xf32>
    %c3_130 = arith.constant 3 : index
    %c0_131 = arith.constant 0 : index
    %c0_132 = arith.constant 0 : index
    %235 = vector.load %arg8[%c3_130, %c0_131, %c0_132] : memref<4x20x8xf32, #tpu.memory_space<vmem>>, vector<1x20x8xf32>
    %236 = vector.shape_cast %235 : vector<1x20x8xf32> to vector<20x8xf32>
    %cst_133 = arith.constant dense<0.000000e+00> : vector<20x8xf32>
    %237 = tpu.matmul %202, %236, %cst_133 {dimension_numbers = #tpu.dot_dimension_numbers<[1], [0], [0], [1], [0, 0, 1, 1], [], []>} : vector<20x20xf32>, vector<20x8xf32>, vector<20x8xf32> -> vector<20x8xf32>
    %cst_134 = arith.constant dense<0.000000e+00> : vector<20x20xf32>
    %238 = tpu.matmul %231, %234, %cst_134 {dimension_numbers = #tpu.dot_dimension_numbers<[1], [1], [0], [0], [0, 0, 1, 0], [], []>} : vector<20x8xf32>, vector<20x8xf32>, vector<20x20xf32> -> vector<20x20xf32>
    %239 = arith.addf %238, %17 : vector<20x20xf32>
    %cst_135 = arith.constant dense<0xFF800000> : vector<20xf32>
    %240 = vector.multi_reduction <maximumf>, %239, %cst_135 [1] : vector<20x20xf32> to vector<20xf32>
    %241 = vector.shape_cast %240 : vector<20xf32> to vector<20x1xf32>
    %242 = vector.broadcast %241 : vector<20x1xf32> to vector<20x20xf32>
    %243 = arith.subf %239, %242 : vector<20x20xf32>
    %244 = math.exp %243 : vector<20x20xf32>
    %cst_136 = arith.constant dense<0.000000e+00> : vector<20xf32>
    %245 = vector.multi_reduction <add>, %244, %cst_136 [1] : vector<20x20xf32> to vector<20xf32>
    %246 = vector.shape_cast %245 : vector<20xf32> to vector<20x1xf32>
    %247 = tpu.reciprocal %246 {approx = true} : vector<20x1xf32> -> vector<20x1xf32>
    %248 = vector.broadcast %247 : vector<20x1xf32> to vector<20x20xf32>
    %249 = arith.mulf %244, %248 : vector<20x20xf32>
    %cst_137 = arith.constant dense<0.000000e+00> : vector<20x8xf32>
    %250 = tpu.matmul %249, %237, %cst_137 {dimension_numbers = #tpu.dot_dimension_numbers<[1], [0], [0], [1], [0, 0, 1, 1], [], []>} : vector<20x20xf32>, vector<20x8xf32>, vector<20x8xf32> -> vector<20x8xf32>
    %c3_138 = arith.constant 3 : index
    %c0_139 = arith.constant 0 : index
    %c0_140 = arith.constant 0 : index
    %251 = vector.load %arg9[%c3_138, %c0_139, %c0_140] : memref<4x8x20xf32, #tpu.memory_space<vmem>>, vector<1x8x20xf32>
    %252 = vector.shape_cast %251 : vector<1x8x20xf32> to vector<8x20xf32>
    %cst_141 = arith.constant dense<0.000000e+00> : vector<20x20xf32>
    %253 = tpu.matmul %250, %252, %cst_141 {dimension_numbers = #tpu.dot_dimension_numbers<[1], [0], [0], [1], [0, 0, 1, 1], [], []>} : vector<20x8xf32>, vector<8x20xf32>, vector<20x20xf32> -> vector<20x20xf32>
    %254 = arith.addf %228, %253 : vector<20x20xf32>
    %c1_142 = arith.constant 1 : index
    %c0_143 = arith.constant 0 : index
    %c0_144 = arith.constant 0 : index
    %255 = vector.load %arg10[%c1_142, %c0_143, %c0_144] : memref<2x2x20xf32, #tpu.memory_space<vmem>>, vector<1x2x20xf32>
    %256 = vector.shape_cast %255 : vector<1x2x20xf32> to vector<2x20xf32>
    %257 = vector.extract_strided_slice %256 {offsets = [0, 0], sizes = [1, 20], strides = [1, 1]} : vector<2x20xf32> to vector<1x20xf32>
    %258 = vector.extract_strided_slice %256 {offsets = [1, 0], sizes = [1, 20], strides = [1, 1]} : vector<2x20xf32> to vector<1x20xf32>
    %cst_145 = arith.constant dense<0.000000e+00> : vector<20xf32>
    %259 = vector.multi_reduction <add>, %254, %cst_145 [1] : vector<20x20xf32> to vector<20xf32>
    %260 = vector.shape_cast %259 : vector<20xf32> to vector<20x1xf32>
    %cst_146 = arith.constant 2.000000e+01 : f32
    %261 = vector.broadcast %cst_146 : f32 to vector<20x1xf32>
    %262 = arith.divf %260, %261 : vector<20x1xf32>
    %263 = vector.broadcast %262 : vector<20x1xf32> to vector<20x20xf32>
    %264 = arith.subf %254, %263 : vector<20x20xf32>
    %265 = arith.mulf %264, %264 : vector<20x20xf32>
    %cst_147 = arith.constant dense<0.000000e+00> : vector<20xf32>
    %266 = vector.multi_reduction <add>, %265, %cst_147 [1] : vector<20x20xf32> to vector<20xf32>
    %267 = vector.shape_cast %266 : vector<20xf32> to vector<20x1xf32>
    %cst_148 = arith.constant 2.000000e+01 : f32
    %268 = vector.broadcast %cst_148 : f32 to vector<20x1xf32>
    %269 = arith.divf %267, %268 : vector<20x1xf32>
    %270 = vector.broadcast %262 : vector<20x1xf32> to vector<20x20xf32>
    %271 = arith.subf %254, %270 : vector<20x20xf32>
    %cst_149 = arith.constant 9.99999974E-6 : f32
    %272 = vector.broadcast %cst_149 : f32 to vector<20x1xf32>
    %273 = arith.addf %269, %272 : vector<20x1xf32>
    %274 = math.rsqrt %273 : vector<20x1xf32>
    %275 = vector.broadcast %274 : vector<20x1xf32> to vector<20x20xf32>
    %276 = arith.mulf %271, %275 : vector<20x20xf32>
    %277 = vector.broadcast %257 : vector<1x20xf32> to vector<20x20xf32>
    %278 = arith.mulf %276, %277 : vector<20x20xf32>
    %279 = vector.broadcast %258 : vector<1x20xf32> to vector<20x20xf32>
    %280 = arith.addf %278, %279 : vector<20x20xf32>
    %c1_150 = arith.constant 1 : index
    %c0_151 = arith.constant 0 : index
    %c0_152 = arith.constant 0 : index
    %281 = vector.load %arg11[%c1_150, %c0_151, %c0_152] : memref<2x20x32xf32, #tpu.memory_space<vmem>>, vector<1x20x32xf32>
    %282 = vector.shape_cast %281 : vector<1x20x32xf32> to vector<20x32xf32>
    %cst_153 = arith.constant dense<0.000000e+00> : vector<20x32xf32>
    %283 = tpu.matmul %280, %282, %cst_153 {dimension_numbers = #tpu.dot_dimension_numbers<[1], [0], [0], [1], [0, 0, 1, 1], [], []>} : vector<20x20xf32>, vector<20x32xf32>, vector<20x32xf32> -> vector<20x32xf32>
    %c1_154 = arith.constant 1 : index
    %c0_155 = arith.constant 0 : index
    %c0_156 = arith.constant 0 : index
    %284 = vector.load %arg12[%c1_154, %c0_155, %c0_156] : memref<2x1x32xf32, #tpu.memory_space<vmem>>, vector<1x1x32xf32>
    %285 = vector.shape_cast %284 : vector<1x1x32xf32> to vector<1x32xf32>
    %286 = vector.broadcast %285 : vector<1x32xf32> to vector<20x32xf32>
    %287 = arith.addf %283, %286 : vector<20x32xf32>
    %cst_157 = arith.constant 5.000000e-01 : f32
    %288 = vector.broadcast %cst_157 : f32 to vector<20x32xf32>
    %289 = arith.mulf %288, %287 : vector<20x32xf32>
    %cst_158 = arith.constant 0.707106769 : f32
    %290 = vector.broadcast %cst_158 : f32 to vector<20x32xf32>
    %291 = arith.mulf %287, %290 : vector<20x32xf32>
    %292 = math.erf %291 : vector<20x32xf32>
    %cst_159 = arith.constant 1.000000e+00 : f32
    %293 = vector.broadcast %cst_159 : f32 to vector<20x32xf32>
    %294 = arith.addf %293, %292 : vector<20x32xf32>
    %295 = arith.mulf %289, %294 : vector<20x32xf32>
    %c1_160 = arith.constant 1 : index
    %c0_161 = arith.constant 0 : index
    %c0_162 = arith.constant 0 : index
    %296 = vector.load %arg13[%c1_160, %c0_161, %c0_162] : memref<2x32x20xf32, #tpu.memory_space<vmem>>, vector<1x32x20xf32>
    %297 = vector.shape_cast %296 : vector<1x32x20xf32> to vector<32x20xf32>
    %cst_163 = arith.constant dense<0.000000e+00> : vector<20x20xf32>
    %298 = tpu.matmul %295, %297, %cst_163 {dimension_numbers = #tpu.dot_dimension_numbers<[1], [0], [0], [1], [0, 0, 1, 1], [], []>} : vector<20x32xf32>, vector<32x20xf32>, vector<20x20xf32> -> vector<20x20xf32>
    %c1_164 = arith.constant 1 : index
    %c0_165 = arith.constant 0 : index
    %c0_166 = arith.constant 0 : index
    %299 = vector.load %arg14[%c1_164, %c0_165, %c0_166] : memref<2x1x20xf32, #tpu.memory_space<vmem>>, vector<1x1x20xf32>
    %300 = vector.shape_cast %299 : vector<1x1x20xf32> to vector<1x20xf32>
    %301 = vector.broadcast %300 : vector<1x20xf32> to vector<20x20xf32>
    %302 = arith.addf %298, %301 : vector<20x20xf32>
    %303 = arith.addf %302, %254 : vector<20x20xf32>
    %cst_167 = arith.constant dense<0.000000e+00> : vector<2x20xf32>
    %304 = tpu.matmul %30, %303, %cst_167 {dimension_numbers = #tpu.dot_dimension_numbers<[1], [0], [0], [1], [0, 0, 1, 1], [], []>} : vector<2x20xf32>, vector<20x20xf32>, vector<2x20xf32> -> vector<2x20xf32>
    %c0_168 = arith.constant 0 : index
    %c0_169 = arith.constant 0 : index
    %305 = vector.load %arg15[%c0_168, %c0_169] : memref<2x20xf32, #tpu.memory_space<vmem>>, vector<2x20xf32>
    %306 = vector.extract_strided_slice %305 {offsets = [0, 0], sizes = [1, 20], strides = [1, 1]} : vector<2x20xf32> to vector<1x20xf32>
    %307 = vector.extract_strided_slice %305 {offsets = [1, 0], sizes = [1, 20], strides = [1, 1]} : vector<2x20xf32> to vector<1x20xf32>
    %cst_170 = arith.constant dense<0.000000e+00> : vector<2xf32>
    %308 = vector.multi_reduction <add>, %304, %cst_170 [1] : vector<2x20xf32> to vector<2xf32>
    %309 = vector.shape_cast %308 : vector<2xf32> to vector<2x1xf32>
    %cst_171 = arith.constant 2.000000e+01 : f32
    %310 = vector.broadcast %cst_171 : f32 to vector<2x1xf32>
    %311 = arith.divf %309, %310 : vector<2x1xf32>
    %312 = vector.broadcast %311 : vector<2x1xf32> to vector<2x20xf32>
    %313 = arith.subf %304, %312 : vector<2x20xf32>
    %314 = arith.mulf %313, %313 : vector<2x20xf32>
    %cst_172 = arith.constant dense<0.000000e+00> : vector<2xf32>
    %315 = vector.multi_reduction <add>, %314, %cst_172 [1] : vector<2x20xf32> to vector<2xf32>
    %316 = vector.shape_cast %315 : vector<2xf32> to vector<2x1xf32>
    %cst_173 = arith.constant 2.000000e+01 : f32
    %317 = vector.broadcast %cst_173 : f32 to vector<2x1xf32>
    %318 = arith.divf %316, %317 : vector<2x1xf32>
    %319 = vector.broadcast %311 : vector<2x1xf32> to vector<2x20xf32>
    %320 = arith.subf %304, %319 : vector<2x20xf32>
    %cst_174 = arith.constant 9.99999974E-6 : f32
    %321 = vector.broadcast %cst_174 : f32 to vector<2x1xf32>
    %322 = arith.addf %318, %321 : vector<2x1xf32>
    %323 = math.rsqrt %322 : vector<2x1xf32>
    %324 = vector.broadcast %323 : vector<2x1xf32> to vector<2x20xf32>
    %325 = arith.mulf %320, %324 : vector<2x20xf32>
    %326 = vector.broadcast %306 : vector<1x20xf32> to vector<2x20xf32>
    %327 = arith.mulf %325, %326 : vector<2x20xf32>
    %328 = vector.broadcast %307 : vector<1x20xf32> to vector<2x20xf32>
    %329 = arith.addf %327, %328 : vector<2x20xf32>
    %c0_175 = arith.constant 0 : index
    %c0_176 = arith.constant 0 : index
    %330 = vector.load %arg16[%c0_175, %c0_176] : memref<20x3xf32, #tpu.memory_space<vmem>>, vector<20x3xf32>
    %cst_177 = arith.constant dense<0.000000e+00> : vector<2x3xf32>
    %331 = tpu.matmul %329, %330, %cst_177 {dimension_numbers = #tpu.dot_dimension_numbers<[1], [0], [0], [1], [0, 0, 1, 1], [], []>} : vector<2x20xf32>, vector<20x3xf32>, vector<2x3xf32> -> vector<2x3xf32>
    %c0_178 = arith.constant 0 : index
    %c0_179 = arith.constant 0 : index
    %332 = vector.load %arg17[%c0_178, %c0_179] : memref<1x3xf32, #tpu.memory_space<vmem>>, vector<1x3xf32>
    %333 = vector.broadcast %332 : vector<1x3xf32> to vector<2x3xf32>
    %334 = arith.addf %331, %333 : vector<2x3xf32>
    %c0_180 = arith.constant 0 : index
    %c0_181 = arith.constant 0 : index
    %335 = vector.load %arg18[%c0_180, %c0_181] : memref<2x3xf32, #tpu.memory_space<vmem>>, vector<2x3xf32>
    tpu.vector_store %arg18[%c0_180, %c0_181], %334 {strides = array<i32>} : memref<2x3xf32, #tpu.memory_space<vmem>>, vector<2x3xf32>,
    return
  }
  func.func @transform_0(%arg0: i32) -> (i32, i32, i32) {
    %c0_i32 = arith.constant 0 : i32
    %c0_i32_0 = arith.constant 0 : i32
    %c0_i32_1 = arith.constant 0 : i32
    return %c0_i32, %arg0, %c0_i32_0 : i32, i32, i32
  }
  func.func @transform_1(%arg0: i32) -> (i32, i32) {
    %c0_i32 = arith.constant 0 : i32
    %c0_i32_0 = arith.constant 0 : i32
    %c0_i32_1 = arith.constant 0 : i32
    return %c0_i32, %c0_i32_0 : i32, i32
  }
  func.func @transform_2(%arg0: i32) -> (i32, i32) {
    %c0_i32 = arith.constant 0 : i32
    %c0_i32_0 = arith.constant 0 : i32
    %c0_i32_1 = arith.constant 0 : i32
    return %c0_i32, %c0_i32_0 : i32, i32
  }
  func.func @transform_3(%arg0: i32) -> (i32, i32) {
    %c0_i32 = arith.constant 0 : i32
    %c0_i32_0 = arith.constant 0 : i32
    %c0_i32_1 = arith.constant 0 : i32
    return %c0_i32, %c0_i32_0 : i32, i32
  }
  func.func @transform_4(%arg0: i32) -> (i32, i32, i32) {
    %c0_i32 = arith.constant 0 : i32
    %c0_i32_0 = arith.constant 0 : i32
    %c0_i32_1 = arith.constant 0 : i32
    %c0_i32_2 = arith.constant 0 : i32
    return %c0_i32, %c0_i32_0, %c0_i32_1 : i32, i32, i32
  }
  func.func @transform_5(%arg0: i32) -> (i32, i32, i32) {
    %c0_i32 = arith.constant 0 : i32
    %c0_i32_0 = arith.constant 0 : i32
    %c0_i32_1 = arith.constant 0 : i32
    %c0_i32_2 = arith.constant 0 : i32
    return %c0_i32, %c0_i32_0, %c0_i32_1 : i32, i32, i32
  }
  func.func @transform_6(%arg0: i32) -> (i32, i32, i32) {
    %c0_i32 = arith.constant 0 : i32
    %c0_i32_0 = arith.constant 0 : i32
    %c0_i32_1 = arith.constant 0 : i32
    %c0_i32_2 = arith.constant 0 : i32
    return %c0_i32, %c0_i32_0, %c0_i32_1 : i32, i32, i32
  }
  func.func @transform_7(%arg0: i32) -> (i32, i32, i32) {
    %c0_i32 = arith.constant 0 : i32
    %c0_i32_0 = arith.constant 0 : i32
    %c0_i32_1 = arith.constant 0 : i32
    %c0_i32_2 = arith.constant 0 : i32
    return %c0_i32, %c0_i32_0, %c0_i32_1 : i32, i32, i32
  }
  func.func @transform_8(%arg0: i32) -> (i32, i32, i32) {
    %c0_i32 = arith.constant 0 : i32
    %c0_i32_0 = arith.constant 0 : i32
    %c0_i32_1 = arith.constant 0 : i32
    %c0_i32_2 = arith.constant 0 : i32
    return %c0_i32, %c0_i32_0, %c0_i32_1 : i32, i32, i32
  }
  func.func @transform_9(%arg0: i32) -> (i32, i32, i32) {
    %c0_i32 = arith.constant 0 : i32
    %c0_i32_0 = arith.constant 0 : i32
    %c0_i32_1 = arith.constant 0 : i32
    %c0_i32_2 = arith.constant 0 : i32
    return %c0_i32, %c0_i32_0, %c0_i32_1 : i32, i32, i32
  }
  func.func @transform_10(%arg0: i32) -> (i32, i32, i32) {
    %c0_i32 = arith.constant 0 : i32
    %c0_i32_0 = arith.constant 0 : i32
    %c0_i32_1 = arith.constant 0 : i32
    %c0_i32_2 = arith.constant 0 : i32
    return %c0_i32, %c0_i32_0, %c0_i32_1 : i32, i32, i32
  }
  func.func @transform_11(%arg0: i32) -> (i32, i32, i32) {
    %c0_i32 = arith.constant 0 : i32
    %c0_i32_0 = arith.constant 0 : i32
    %c0_i32_1 = arith.constant 0 : i32
    %c0_i32_2 = arith.constant 0 : i32
    return %c0_i32, %c0_i32_0, %c0_i32_1 : i32, i32, i32
  }
  func.func @transform_12(%arg0: i32) -> (i32, i32, i32) {
    %c0_i32 = arith.constant 0 : i32
    %c0_i32_0 = arith.constant 0 : i32
    %c0_i32_1 = arith.constant 0 : i32
    %c0_i32_2 = arith.constant 0 : i32
    return %c0_i32, %c0_i32_0, %c0_i32_1 : i32, i32, i32
  }
  func.func @transform_13(%arg0: i32) -> (i32, i32, i32) {
    %c0_i32 = arith.constant 0 : i32
    %c0_i32_0 = arith.constant 0 : i32
    %c0_i32_1 = arith.constant 0 : i32
    %c0_i32_2 = arith.constant 0 : i32
    return %c0_i32, %c0_i32_0, %c0_i32_1 : i32, i32, i32
  }
  func.func @transform_14(%arg0: i32) -> (i32, i32) {
    %c0_i32 = arith.constant 0 : i32
    %c0_i32_0 = arith.constant 0 : i32
    %c0_i32_1 = arith.constant 0 : i32
    return %c0_i32, %c0_i32_0 : i32, i32
  }
  func.func @transform_15(%arg0: i32) -> (i32, i32) {
    %c0_i32 = arith.constant 0 : i32
    %c0_i32_0 = arith.constant 0 : i32
    %c0_i32_1 = arith.constant 0 : i32
    return %c0_i32, %c0_i32_0 : i32, i32
  }
  func.func @transform_16(%arg0: i32) -> (i32, i32) {
    %c0_i32 = arith.constant 0 : i32
    %c0_i32_0 = arith.constant 0 : i32
    %c0_i32_1 = arith.constant 0 : i32
    return %c0_i32, %c0_i32_0 : i32, i32
  }
  func.func @transform_17(%arg0: i32) -> (i32, i32) {
    %c0_i32 = arith.constant 0 : i32
    %c0_i32_0 = arith.constant 0 : i32
    return %arg0, %c0_i32 : i32, i32
  }
}

</mosaic_0001>

<bundles_post_ra>
// kernel: tile.9
= control target key start
LH: loop header
LB: loop body
LE: loop exit
PB: predicated region body
PF: predicated region fallthrough
CT: control target
= control target key end

     0   :  { %vm3_vm0 = vcmask 162816   ;;  %s60_s0 = inlined_call_operand.vmem [shape: f32[2,10,20], index: 0, kind: input, shape index: {}]   ;;  %s61_s1 = inlined_call_operand.vmem [shape: f32[20,20], index: 1, kind: output, shape index: {}]  }
   0x1   :  { %v2_v0 = vld [vmem:[%s60_s0] sm:$0xff]   ;;  %v20_v1 = vld [vmem:[%s60_s0 + $0x8] sm:$0x3]   ;;  %v22_v2 = vld [vmem:[%s60_s0 + $0x10] sm:$0xff]  }
   0x2   :  { %4 = vst.msk [vmem:[%s61_s1] sm:$0xff] %vm3_vm0, %v2_v0   ;;  %21 = vst.msk [vmem:[%s61_s1 + $0x8] sm:$0x3] %vm3_vm0, %v20_v1   ;;  %v24_v3 = vld [vmem:[%s60_s0 + $0x18] sm:$0x3]  }
   0x3   :  { %23 = vst.msk [vmem:[%s61_s1 + $0xa] sm:$0xff] %vm3_vm0, %v22_v2   ;;  %25 = vst.msk [vmem:[%s61_s1 + $0x12] sm:$0x3] %vm3_vm0, %v24_v3  }

// kernel: forward_pallas.1
= control target key start
LH: loop header
LB: loop body
LE: loop exit
PB: predicated region body
PF: predicated region fallthrough
CT: control target
= control target key end

     0   :  { %s5469_s0 = inlined_call_operand.vmem [shape: f32[2,20,19], index: 0, kind: input, shape index: {}]   ;;  %s5470_s1 = inlined_call_operand.vmem [shape: f32[19,20], index: 1, kind: input, shape index: {}]   ;;  %s5471_s2 = inlined_call_operand.vmem [shape: f32[1,20], index: 2, kind: input, shape index: {}]   ;;  %s5472_s3 = inlined_call_operand.vmem [shape: f32[20,20], index: 3, kind: input, shape index: {}]   ;;  %s5473_s4 = inlined_call_operand.vmem [shape: f32[2,2,20], index: 4, kind: input, shape index: {}]   ;;  %s5474_s5 = inlined_call_operand.vmem [shape: f32[4,20,8], index: 5, kind: input, shape index: {}]   ;;  %s5475_s6 = inlined_call_operand.vmem [shape: f32[4,20,8], index: 6, kind: input, shape index: {}]   ;;  %s5476_s7 = inlined_call_operand.vmem [shape: f32[4,20,8], index: 7, kind: input, shape index: {}]   ;;  %s5477_s8 = inlined_call_operand.vmem [shape: f32[4,8,20], index: 8, kind: input, shape index: {}]   ;;  %s5478_s9 = inlined_call_operand.vmem [shape: f32[2,2,20], index: 9, kind: input, shape index: {}]   ;;  %s5479_s10 = inlined_call_operand.vmem [shape: f32[2,20,32], index: 10, kind: input, shape index: {}]   ;;  %s5480_s11 = inlined_call_operand.vmem [shape: f32[2,1,32], index: 11, kind: input, shape index: {}]   ;;  %s5481_s12 = inlined_call_operand.vmem [shape: f32[2,32,20], index: 12, kind: input, shape index: {}]   ;;  %s5482_s13 = inlined_call_operand.vmem [shape: f32[2,1,20], index: 13, kind: input, shape index: {}]   ;;  %s5483_s14 = inlined_call_operand.vmem [shape: f32[2,20], index: 14, kind: input, shape index: {}]   ;;  %s5484_s15 = inlined_call_operand.vmem [shape: f32[20,3], index: 15, kind: input, shape index: {}]   ;;  %s5485_s16 = inlined_call_operand.vmem [shape: f32[1,3], index: 16, kind: input, shape index: {}]   ;;  %s5486_s17 = inlined_call_operand.hbm [shape: f32[2,3], index: 17, kind: output, shape index: {}]  }
   0x1   :  { %5489 = sst [smem:[#allocation5_spill]] %s5469_s0 }
   0x2   :  { %5490 = sst [smem:[#allocation6_spill]] %s5470_s1 }
   0x3   :  { %s5491_s26 = sld [smem:[#allocation6_spill]]  ;;  %v4540_v2 = vmov 0.0|0.0   ;;  %vm4541_vm0 = vmmov 0   ;;  %v4542_v4 = vmov 0.0  }
   0x4   :  { %4313 = vmatprep.subr.bf16.mxu0 %v4540_v2  ;;  %4316 = vmatprep.subr.bf16.mxu1 %v4540_v2 }
   0x5   :  { %3863 = vmatprep.mubr.msk.f32.mxu0 %vm4541_vm0, %v4542_v4  ;;  %3878 = vmatprep.mubr.msk.f32.mxu1 %vm4541_vm0, %v4542_v4 }
   0x9   :  { %v87_v0 = vld [vmem:[%s5491_s26] sm:$0xff]  ;;  %v88_v1 = vld [vmem:[%s5491_s26 + $0x8] sm:$0xff] }
   0xa   :  { %v4314_v3 = vpack.c.bf16 %v88_v1, %v87_v0 }
   0xc   :  { %4315 = vmatpush3.bf16.msra.mxu0 %v4314_v3  ;;  %4318 = vmatpush3.bf16.msra.mxu1 %v4314_v3 }
   0xd   :  { %22 = vsyncpa [#allocation3], 0  ;;  %3861 = vmatprep.subr.mxu0 %v4542_v4  ;;  %3876 = vmatprep.subr.mxu1 %v4542_v4  ;;  %v89_v5 = vld [vmem:[%s5491_s26 + $0x10] sm:$0x7]  ;;  %vm110_vm1 = vcmask 1042432   ;;  %s5492_s19 = sld [smem:[#allocation5_spill]] }
   0xe   :  { %vm100_vm2 = vcmask 154624   ;;  %v3499_v12 = vld [vmem:[%s5471_s2] ss:$0 sm:$0xff]  ;;  %vm303_vm3 = vcmask 162816   ;;  %v297_v34 = vld [vmem:[%s5472_s3 + $0x8] sm:$0xff]  ;;  %vm310_vm4 = vcmask 158720  }
   0xf   :  { %v296_v23 = vld [vmem:[%s5472_s3] sm:$0xff]  ;;  %v298_v44 = vld [vmem:[%s5472_s3 + $0x10] sm:$0xf]  ;;  %v360_v1 = vld [vmem:[%s5474_s5 + $0x8] sm:$0xff]  ;;  %vm371_vm5 = vcmask 1043456   ;;  %vm627_vm6 = vcmask 64512  }
  0x10   :  { %3862 = vmatpush3.msk.msra.mxu0 %vm110_vm1, %v89_v5  ;;  %3877 = vmatpush3.msk.msra.mxu1 %vm110_vm1, %v89_v5  ;;  %v359_v0 = vld [vmem:[%s5474_s5] sm:$0xff]  ;;  %vm4814_vm7 = vmpackc.low %vm627_vm6, %vm627_vm6  ;;  %vm1704_vm11 = vcmask 261120   ;;  %vm3373_vm13 = vcmask 156672   ;;  %s4544_s1 = smov [#allocation2]   ;;  %vm3483_vm14 = vcmask 17408  }
  0x11   :  { %4319 = vmatprep.subr.bf16.mxu0 %v4540_v2  ;;  %4322 = vmatprep.subr.bf16.mxu1 %v4540_v2  ;;  %v455_v3 = vld [vmem:[%s5475_s6] sm:$0xff]  ;;  %v4320_v5 = vpack.c.bf16 %v360_v1, %v359_v0  ;;  %s3491_s20 = sshll.u32 %s4544_s1, 4  ;;  %s3492_s20 = int_to_ptr.vmem [resolvable:$true] %s3491_s20 }
  0x12   :  { %p4521_p1 = scmp.lt.s32.totalorder %s3492_s20, %s3492_s20 }
  0x13   :  { %v91_v6 = vld [vmem:[%s5492_s19] sm:$0xff]  ;;  %v3504_v7 = vld [vmem:[%s5492_s19 + $0x18] sm:$0xff]  ;;  %v92_v8 = vld [vmem:[%s5492_s19 + $0x8] sm:$0xff] }
  0x14   :  { %3864 = vmatmul.mubr.msk.f32.vlgmr.msra.gmra.mrb[0].mxu0 %vm100_vm2, %v91_v6  ;;  %3879 = vmatmul.mubr.msk.f32.vlgmr.msra.gmra.mrb[0].mxu1 %vm100_vm2, %v3504_v7  ;;  %v3505_v9 = vld [vmem:[%s5492_s19 + $0x20] sm:$0xff]  ;;  %v93_v10 = vld [vmem:[%s5492_s19 + $0x10] sm:$0xf]  ;;  %v3506_v11 = vld [vmem:[%s5492_s19 + $0x28] sm:$0xf] }
  0x15   :  { %3866 = vmatprep.mubr.msk.f32.mxu0 %vm4541_vm0, %v4542_v4  ;;  %3881 = vmatprep.mubr.msk.f32.mxu1 %vm4541_vm0, %v4542_v4  ;;  %v456_v6 = vld [vmem:[%s5475_s6 + $0x8] sm:$0xff] }
  0x16   :  { %v4323_v7 = vpack.c.bf16 %v456_v6, %v455_v3  ;;  %4321 = vmatpush3.bf16.msra.mxu0 %v4320_v5 }
  0x17   :  { %3891 = vmatprep.subr.mxu0 %v4542_v4 }
  0x18   :  { %3867 = vmatmul.mubr.msk.f32.gmra.mrb[2].mxu0 %vm100_vm2, %v92_v8  ;;  %3882 = vmatmul.mubr.msk.f32.gmra.mrb[2].mxu1 %vm100_vm2, %v3505_v9  ;;  %v361_v8 = vld [vmem:[%s5474_s5 + $0x10] sm:$0xf] }
  0x19   :  { %3869 = vmatprep.mubr.msk.f32.mxu0 %vm4541_vm0, %v4542_v4  ;;  %3884 = vmatprep.mubr.msk.f32.mxu1 %vm4541_vm0, %v4542_v4  ;;  %v457_v9 = vld [vmem:[%s5475_s6 + $0x10] sm:$0xf] }
  0x1a   :  { %4324 = vmatpush3.bf16.msra.mxu1 %v4323_v7  ;;  %3892 = vmatpush3.msk.msra.mxu0 %vm371_vm5, %v361_v8 }
  0x1b   :  { %3906 = vmatprep.subr.mxu1 %v4542_v4  ;;  %4325 = vmatprep.subr.bf16.mxu0 %v4540_v2 }
  0x1c   :  { %3870 = vmatmul.mubr.msk.f32.gmra.mrb[4].mxu0 %vm100_vm2, %v93_v10  ;;  %3885 = vmatmul.mubr.msk.f32.gmra.mrb[4].mxu1 %vm100_vm2, %v3506_v11 }
  0x1d   :  { %3893 = vmatprep.mubr.msk.f32.mxu0 %vm4541_vm0, %v4542_v4  ;;  %3908 = vmatprep.mubr.msk.f32.mxu1 %vm4541_vm0, %v4542_v4 }
  0x1e   :  { %3907 = vmatpush3.msk.msra.mxu1 %vm371_vm5, %v457_v9 }
  0x1f   :  { %4328 = vmatprep.subr.bf16.mxu1 %v4540_v2 }
  0xe7   :  { %v180_v13 = vpop.f32.mrb[0].mxu0  ;;  %v276_v14 = vpop.f32.mrb[0].mxu1 }
  0xe8   :  { %v181_v15 = vadd.f32 %v3499_v12, %v180_v13  ;;  %v277_v16 = vadd.f32 %v3499_v12, %v276_v14  ;;  %v3865_v17 = vpop.f32.mrb[1].mxu0  ;;  %v3880_v18 = vpop.f32.mrb[1].mxu1 }
  0xea   :  { %v194_v19 = vmax.f32 %v181_v15, 0.0  ;;  %v290_v20 = vmax.f32 %v277_v16, 0.0 }
  0xeb   :  { %v185_v21 = vpop.f32.mrb[2].mxu0  ;;  %v281_v22 = vpop.f32.mrb[2].mxu1 }
  0xec   :  { %v293_v24 = vmax.f32 %v194_v19, %v290_v20  ;;  %v186_v25 = vadd.f32 %v3499_v12, %v185_v21  ;;  %v282_v26 = vadd.f32 %v3499_v12, %v281_v22  ;;  %v3868_v27 = vpop.f32.mrb[3].mxu0  ;;  %v3883_v28 = vpop.f32.mrb[3].mxu1  ;;  %v302_v21 = vld [vmem:[%s5473_s4] sm:$0x3] }
  0xed   :  { %v541_v28 = vld [vmem:[%s5476_s7] sm:$0xff] }
  0xee   :  { %v195_v29 = vmax.f32 %v186_v25, 0.0  ;;  %v291_v30 = vmax.f32 %v282_v26, 0.0  ;;  %v4696_v31 = vadd.f32 %v296_v23, %v293_v24 }
  0xef   :  { %v190_v32 = vpop.f32.mrb[4].mxu0  ;;  %v286_v33 = vpop.f32.mrb[4].mxu1 }
  0xf0   :  { %v294_v35 = vmax.f32 %v195_v29, %v291_v30  ;;  %v191_v36 = vadd.f32 %v3499_v12, %v190_v32  ;;  %v287_v37 = vadd.f32 %v3499_v12, %v286_v33  ;;  %v304_v38 = vsel %vm303_vm3, %v4696_v31, 0.0  ;;  %v3886_v39 = vpop.f32.mrb[5].mxu1  ;;  %v3871_v40 = vpop.f32.mrb[5].mxu0  ;;  %v542_v29 = vld [vmem:[%s5476_s7 + $0x8] sm:$0xff] }
  0xf1   :  { %305 = vadd.xlane.f32.xlu0 %v304_v38  ;;  %v57_v12 = vlaneseq  ;;  %v543_v40 = vld [vmem:[%s5476_s7 + $0x10] sm:$0xf] }
  0xf2   :  { %v196_v41 = vmax.f32 %v191_v36, 0.0  ;;  %v292_v42 = vmax.f32 %v287_v37, 0.0  ;;  %v4703_v43 = vadd.f32 %v297_v34, %v294_v35  ;;  %v4326_v35 = vpack.c.bf16 %v542_v29, %v541_v28 }
  0xf3   :  { %v4745_v16 = vshrl.u32 %v57_v12, 7  ;;  %v74_v3 = vand.u32 127, %v57_v12 }
  0xf4   :  { %v295_v45 = vmax.f32 %v196_v41, %v292_v42  ;;  %v307_v46 = vsel %vm303_vm3, %v4703_v43, 0.0 }
  0xf5   :  { %308 = vadd.xlane.f32.xlu0 %v307_v46  ;;  %v4748_v20 = vsub.s32 0, %v4745_v16  ;;  %v4754_v23 = vsub.s32 1, %v4745_v16  ;;  %v61_v5 = vcvt.s32.f32 %v4745_v16  ;;  %v75_v6 = vcvt.s32.f32 %v74_v3 }
  0xf6   :  { %v4710_v47 = vadd.f32 %v298_v44, %v295_v45  ;;  %v59_v7 = vadd.s32 8, %v4745_v16 }
  0xf7   :  { %v348_v24 = vrot.slane %v302_v21, %v4748_v20  ;;  %v355_v27 = vrot.slane %v302_v21, %v4754_v23  ;;  %v64_v8 = vadd.f32 0.5, %v61_v5  ;;  %v76_v9 = vadd.f32 0.5, %v75_v6 }
  0xf8   :  { %v311_v48 = vsel %vm310_vm4, %v4710_v47, 0.0 }
  0xf9   :  { %312 = vadd.xlane.f32.xlu1 %v311_v48 }
 0x17e   :  { %v306_v49 = vpop.xlane.xlu0 %305 }
 0x17f   :  { %v315_v50 = vmul.f32 0.05, %v306_v49 }
 0x181   :  { %v318_v51 = vsub.f32 %v4696_v31, %v315_v50 }
 0x182   :  { %v309_v52 = vpop.xlane.xlu0 %308 }
 0x183   :  { %v316_v53 = vmul.f32 0.05, %v309_v52  ;;  %v321_v54 = vmul.f32 %v318_v51, %v318_v51 }
 0x185   :  { %v319_v55 = vsub.f32 %v4703_v43, %v316_v53  ;;  %v324_v56 = vsel %vm303_vm3, %v321_v54, 0.0 }
 0x186   :  { %325 = vadd.xlane.f32.xlu1 %v324_v56  ;;  %v313_v57 = vpop.xlane.xlu1 %312 }
 0x187   :  { %v317_v58 = vmul.f32 0.05, %v313_v57  ;;  %v322_v59 = vmul.f32 %v319_v55, %v319_v55 }
 0x189   :  { %v320_v60 = vsub.f32 %v4710_v47, %v317_v58  ;;  %v327_v61 = vsel %vm303_vm3, %v322_v59, 0.0 }
 0x18a   :  { %328 = vadd.xlane.f32.xlu0 %v327_v61 }
 0x18b   :  { %v323_v62 = vmul.f32 %v320_v60, %v320_v60 }
 0x18d   :  { %v330_v63 = vsel %vm310_vm4, %v323_v62, 0.0 }
 0x18e   :  { %331 = vadd.xlane.f32.xlu1 %v330_v63 }
 0x213   :  { %v326_v10 = vpop.xlane.xlu1 %325 }
 0x214   :  { %v333_v11 = vmul.f32 0.05, %v326_v10  ;;  %v62_v10 = vcvt.s32.f32 %v59_v7  ;;  %v3536_v7 = vld [vmem:[%s5474_s5 + $0x18] sm:$0xff] }
 0x216   :  { %v336_v13 = vadd.f32 1e-05, %v333_v11  ;;  %v60_v11 = vadd.s32 16, %v4745_v16 }
 0x217   :  { %v329_v14 = vpop.xlane.xlu0 %328 }
 0x218   :  { %4430 = vrsqrt.f32 %v336_v13  ;;  %v334_v15 = vmul.f32 0.05, %v329_v14  ;;  %v67_v13 = vmul.f32 0.1, %v64_v8  ;;  %v77_v14 = vmul.f32 0.1, %v76_v9 }
 0x219   :  { %v3537_v8 = vld [vmem:[%s5474_s5 + $0x20] sm:$0xff] }
 0x21a   :  { %v337_v17 = vadd.f32 1e-05, %v334_v15  ;;  %v65_v15 = vadd.f32 0.5, %v62_v10  ;;  %v4336_v10 = vpack.c.bf16 %v3537_v8, %v3536_v7 }
 0x21b   :  { %v332_v18 = vpop.xlane.xlu1 %331 }
 0x21c   :  { %4432 = vrsqrt.f32 %v337_v17  ;;  %v335_v19 = vmul.f32 0.05, %v332_v18  ;;  %v63_v17 = vcvt.s32.f32 %v60_v11  ;;  %v70_v18 = vfloor.f32 %v67_v13 }
 0x21d   :  { %v68_v12 = vmul.f32 0.1, %v65_v15  ;;  %v3538_v15 = vld [vmem:[%s5474_s5 + $0x28] sm:$0xf] }
 0x21e   :  { %v338_v22 = vadd.f32 1e-05, %v335_v19  ;;  %v4841_v19 = vfloor.f32 %v77_v14  ;;  %v66_v21 = vadd.f32 0.5, %v63_v17 }
 0x220   :  { %4434 = vrsqrt.f32 %v338_v22  ;;  %vm79_vm8 = vcmp.eq.f32.partialorder %v70_v18, %v4841_v19  ;;  %v71_v22 = vfloor.f32 %v68_v12  ;;  %v3550_v12 = vld [vmem:[%s5476_s7 + $0x18] sm:$0xff]  ;;  %vm85_vm12 = vcmp.eq.f32.partialorder %v61_v5, %v4841_v19 }
 0x222   :  { %v4431_v25 = vpop.eup %4430  ;;  %vm80_vm9 = vcmp.eq.f32.partialorder %v71_v22, %v4841_v19 }
 0x223   :  { %v342_v26 = vmul.f32 %v4431_v25, %v318_v51  ;;  %v4543_v25 = vmov -1e+30  }
 0x225   :  { %v349_v30 = vmul.f32 %v348_v24, %v342_v26  ;;  %v4844_v26 = vsel %vm79_vm8, 0.0, %v4543_v25 }
 0x226   :  { %v4433_v32 = vpop.eup %4432 }
 0x227   :  { %v4764_v33 = vadd.f32 %v355_v27, %v349_v30  ;;  %v343_v34 = vmul.f32 %v4433_v32, %v319_v55  ;;  %v4848_v32 = vsel %vm80_vm9, 0.0, %v4543_v25 }
 0x229   :  { %v350_v36 = vmul.f32 %v348_v24, %v343_v34  ;;  %3894 = vmatmul.mubr.msk.f32.vlgmr.msra.gmra.mrb[6].mxu0 %vm303_vm3, %v4764_v33  ;;  %3909 = vmatmul.mubr.msk.f32.vlgmr.msra.gmra.mrb[6].mxu1 %vm303_vm3, %v4764_v33 }
 0x22a   :  { %v4435_v37 = vpop.eup %4434  ;;  %3896 = vmatprep.mubr.msk.f32.mxu0 %vm4541_vm0, %v4542_v4  ;;  %3911 = vmatprep.mubr.msk.f32.mxu1 %vm4541_vm0, %v4542_v4 }
 0x22b   :  { %v4774_v38 = vadd.f32 %v355_v27, %v350_v36  ;;  %v344_v39 = vmul.f32 %v4435_v37, %v320_v60  ;;  %4327 = vmatpush3.bf16.msra.mxu0 %v4326_v35 }
 0x22c   :  { %3921 = vmatprep.subr.mxu0 %v4542_v4 }
 0x22d   :  { %v351_v41 = vmul.f32 %v348_v24, %v344_v39  ;;  %3897 = vmatmul.mubr.msk.f32.gmra.mrb[8].mxu0 %vm303_vm3, %v4774_v38  ;;  %3912 = vmatmul.mubr.msk.f32.gmra.mrb[8].mxu1 %vm303_vm3, %v4774_v38  ;;  %v69_v24 = vmul.f32 0.1, %v66_v21  ;;  %v3551_v21 = vld [vmem:[%s5476_s7 + $0x20] sm:$0xff] }
 0x22e   :  { %3899 = vmatprep.mubr.msk.f32.mxu0 %vm4541_vm0, %v4542_v4  ;;  %3914 = vmatprep.mubr.msk.f32.mxu1 %vm4541_vm0, %v4542_v4  ;;  %v4342_v22 = vpack.c.bf16 %v3551_v21, %v3550_v12 }
 0x22f   :  { %v4788_v42 = vadd.f32 %v355_v27, %v351_v41  ;;  %3922 = vmatpush3.msk.msra.mxu0 %vm371_vm5, %v543_v40  ;;  %v72_v27 = vfloor.f32 %v69_v24  ;;  %v3552_v24 = vld [vmem:[%s5476_s7 + $0x28] sm:$0xf] }
 0x230   :  { %4332 = vmatprep.subr.bf16.mxu0 %v4540_v2 }
 0x231   :  { %3900 = vmatmul.mubr.msk.f32.gmra.mrb[10].mxu0 %vm303_vm3, %v4788_v42  ;;  %3915 = vmatmul.mubr.msk.f32.gmra.mrb[10].mxu1 %vm303_vm3, %v4788_v42  ;;  %vm81_vm10 = vcmp.eq.f32.partialorder %v72_v27, %v4841_v19  ;;  %v3544_v27 = vld [vmem:[%s5475_s6 + $0x20] sm:$0xff] }
 0x232   :  { %3923 = vmatprep.mubr.msk.f32.mxu0 %vm4541_vm0, %v4542_v4  ;;  %3938 = vmatprep.mubr.msk.f32.mxu1 %vm4541_vm0, %v4542_v4  ;;  %v4853_v39 = vsel %vm81_vm10, 0.0, %v4543_v25  ;;  %v3543_v25 = vld [vmem:[%s5475_s6 + $0x18] sm:$0xff] }
 0x235   :  { %3924 = vmatmul.mubr.msk.f32.vlgmr.msra.gmra.mrb[12].mxu0 %vm303_vm3, %v4764_v33 }
 0x236   :  { %3926 = vmatprep.mubr.msk.f32.mxu0 %vm4541_vm0, %v4542_v4 }
 0x239   :  { %3927 = vmatmul.mubr.msk.f32.gmra.mrb[14].mxu0 %vm303_vm3, %v4774_v38 }
 0x23a   :  { %3929 = vmatprep.mubr.msk.f32.mxu0 %vm4541_vm0, %v4542_v4 }
 0x23d   :  { %3930 = vmatmul.mubr.msk.f32.gmra.mrb[16].mxu0 %vm303_vm3, %v4788_v42 }
 0x23e   :  { %3953 = vmatprep.mubr.msk.f32.mxu0 %vm4541_vm0, %v4542_v4 }
 0x2fc   :  { %v441_v44 = vpop.f32.mrb[6].mxu0  ;;  %v527_v45 = vpop.f32.mrb[6].mxu1 }
 0x2fd   :  { %v3895_v46 = vpop.f32.mrb[7].mxu0  ;;  %v3910_v48 = vpop.f32.mrb[7].mxu1 }
 0x300   :  { %v446_v49 = vpop.f32.mrb[8].mxu0  ;;  %v532_v50 = vpop.f32.mrb[8].mxu1 }
 0x301   :  { %v4329_v52 = vpack.c.bf16 %v532_v50, %v527_v45  ;;  %v3898_v53 = vpop.f32.mrb[9].mxu0  ;;  %v3913_v54 = vpop.f32.mrb[9].mxu1 }
 0x303   :  { %4331 = vmatpush3.bf16.xpose.msk.msra.mxu1 %vm4814_vm7, %v4329_v52 }
 0x304   :  { %v451_v55 = vpop.f32.mrb[10].mxu0  ;;  %v537_v56 = vpop.f32.mrb[10].mxu1  ;;  %3936 = vmatprep.subr.mxu1 %v4542_v4 }
 0x305   :  { %v3901_v57 = vpop.f32.mrb[11].mxu0  ;;  %v3916_v58 = vpop.f32.mrb[11].mxu1 }
 0x308   :  { %v613_v59 = vpop.f32.mrb[12].mxu0 }
 0x309   :  { %v3925_v60 = vpop.f32.mrb[13].mxu0 }
 0x30b   :  { %3937 = vmatpush3.xpose.msk.msra.mxu1 %vm627_vm6, %v537_v56 }
 0x30c   :  { %v618_v61 = vpop.f32.mrb[14].mxu0  ;;  %3962 = vmatprep.subr.mxu1 %v4542_v4 }
 0x30d   :  { %v4333_v62 = vpack.c.bf16 %v618_v61, %v613_v59  ;;  %v3928_v63 = vpop.f32.mrb[15].mxu0 }
 0x30e   :  { %3939 = vmatmul.mubr.msk.f32.vlgmr.msra.gmra.mrb[12].mxu1 %vm627_vm6, %v441_v44 }
 0x30f   :  { %4334 = vmatpush3.bf16.msra.mxu0 %v4333_v62  ;;  %3941 = vmatprep.mubr.msk.f32.mxu1 %vm4541_vm0, %v4542_v4 }
 0x310   :  { %v623_v0 = vpop.f32.mrb[16].mxu0  ;;  %3951 = vmatprep.subr.mxu0 %v4542_v4 }
 0x311   :  { %v3931_v1 = vpop.f32.mrb[17].mxu0 }
 0x312   :  { %3942 = vmatmul.mubr.msk.f32.gmra.mrb[14].mxu1 %vm627_vm6, %v446_v49 }
 0x313   :  { %3952 = vmatpush3.msk.msra.mxu0 %vm371_vm5, %v623_v0  ;;  %3944 = vmatprep.mubr.msk.f32.mxu1 %vm4541_vm0, %v4542_v4  ;;  %v851_v0 = vld [vmem:[%s5477_s8] sm:$0xff] }
 0x314   :  { %4335 = vmatprep.subr.bf16.mxu0 %v4540_v2  ;;  %3963 = vmatpush3.msra.mxu1 %v851_v0 }
 0x315   :  { %4338 = vmatprep.subr.bf16.mxu1 %v4540_v2 }
 0x316   :  { %3945 = vmatmul.mubr.msk.f32.gmra.mrb[16].mxu1 %vm627_vm6, %v451_v55 }
 0x317   :  { %3964 = vmatprep.mubr.msk.f32.mxu1 %vm4541_vm0, %v4542_v4 }
 0x3e1   :  { %v712_v28 = vpop.f32.mrb[12].mxu1 }
 0x3e2   :  { %v713_v29 = vadd.f32 %v712_v28, %v4844_v26  ;;  %v3940_v30 = vpop.f32.mrb[13].mxu1  ;;  %v4339_v28 = vpack.c.bf16 %v3544_v27, %v3543_v25 }
 0x3e4   :  { %v726_v34 = vsel %vm303_vm3, %v713_v29, -inf }
 0x3e5   :  { %v717_v35 = vpop.f32.mrb[14].mxu1  ;;  %727 = vmax.xlane.f32.xlu0 %v726_v34  ;;  %v3545_v34 = vld [vmem:[%s5475_s6 + $0x28] sm:$0xf] }
 0x3e6   :  { %v718_v36 = vadd.f32 %v717_v35, %v4848_v32  ;;  %v3943_v37 = vpop.f32.mrb[15].mxu1 }
 0x3e8   :  { %v729_v40 = vsel %vm303_vm3, %v718_v36, -inf }
 0x3e9   :  { %v722_v41 = vpop.f32.mrb[16].mxu1  ;;  %730 = vmax.xlane.f32.xlu1 %v729_v40 }
 0x3ea   :  { %v723_v44 = vadd.f32 %v722_v41, %v4853_v39  ;;  %v3946_v45 = vpop.f32.mrb[17].mxu1 }
 0x3ec   :  { %v732_v46 = vsel %vm310_vm4, %v723_v44, -inf }
 0x3ed   :  { %733 = vmax.xlane.f32.xlu0 %v732_v46 }
 0x472   :  { %v728_v48 = vpop.xlane.xlu0 %727 }
 0x473   :  { %v735_v49 = vsub.f32 %v713_v29, %v728_v48 }
 0x475   :  { %v738_v50 = vmul.f32 1.442695, %v735_v49 }
 0x476   :  { %v731_v52 = vpop.xlane.xlu1 %730 }
 0x477   :  { %4436 = vpow2.f32 %v738_v50  ;;  %v736_v53 = vsub.f32 %v718_v36, %v731_v52 }
 0x479   :  { %v740_v54 = vmul.f32 1.442695, %v736_v53 }
 0x47a   :  { %v734_v55 = vpop.xlane.xlu0 %733 }
 0x47b   :  { %4438 = vpow2.f32 %v740_v54  ;;  %v737_v56 = vsub.f32 %v723_v44, %v734_v55 }
 0x47d   :  { %v742_v57 = vmul.f32 1.442695, %v737_v56 }
 0x47f   :  { %4440 = vpow2.f32 %v742_v57 }
 0x481   :  { %v4437_v58 = vpop.eup %4436 }
 0x482   :  { %v744_v59 = vsel %vm303_vm3, %v4437_v58, 0.0 }
 0x483   :  { %745 = vadd.xlane.f32.xlu1 %v744_v59 }
 0x485   :  { %v4439_v60 = vpop.eup %4438 }
 0x486   :  { %v747_v61 = vsel %vm303_vm3, %v4439_v60, 0.0 }
 0x487   :  { %748 = vadd.xlane.f32.xlu0 %v747_v61 }
 0x489   :  { %v4441_v62 = vpop.eup %4440 }
 0x48a   :  { %v750_v63 = vsel %vm310_vm4, %v4441_v62, 0.0 }
 0x48b   :  { %751 = vadd.xlane.f32.xlu1 %v750_v63 }
 0x510   :  { %v746_v1 = vpop.xlane.xlu1 %745 }
 0x511   :  { %4442 = vrcp.f32 %v746_v1 }
 0x514   :  { %v749_v3 = vpop.xlane.xlu0 %748 }
 0x515   :  { %4444 = vrcp.f32 %v749_v3 }
 0x518   :  { %v752_v6 = vpop.xlane.xlu1 %751 }
 0x519   :  { %4446 = vrcp.f32 %v752_v6 }
 0x51b   :  { %v4443_v9 = vpop.eup %4442 }
 0x51c   :  { %v756_v11 = vmul.f32 %v4443_v9, %v4437_v58 }
 0x51e   :  { %3954 = vmatmul.mubr.msk.f32.vlgmr.msra.gmra.mrb[18].mxu0 %vm303_vm3, %v756_v11 }
 0x51f   :  { %v4445_v13 = vpop.eup %4444  ;;  %3956 = vmatprep.mubr.msk.f32.mxu0 %vm4541_vm0, %v4542_v4  ;;  %4337 = vmatpush3.bf16.msra.mxu0 %v4336_v10 }
 0x520   :  { %v757_v14 = vmul.f32 %v4445_v13, %v4439_v60  ;;  %3977 = vmatprep.subr.mxu0 %v4542_v4 }
 0x522   :  { %3957 = vmatmul.mubr.msk.f32.gmra.mrb[20].mxu0 %vm303_vm3, %v757_v14 }
 0x523   :  { %v4447_v17 = vpop.eup %4446  ;;  %3959 = vmatprep.mubr.msk.f32.mxu0 %vm4541_vm0, %v4542_v4  ;;  %3978 = vmatpush3.msk.msra.mxu0 %vm371_vm5, %v3538_v15 }
 0x524   :  { %v758_v18 = vmul.f32 %v4447_v17, %v4441_v62  ;;  %4341 = vmatprep.subr.bf16.mxu0 %v4540_v2 }
 0x526   :  { %3960 = vmatmul.mubr.msk.f32.gmra.mrb[22].mxu0 %vm303_vm3, %v758_v18 }
 0x527   :  { %3979 = vmatprep.mubr.msk.f32.mxu0 %vm4541_vm0, %v4542_v4 }
 0x52a   :  { %3980 = vmatmul.mubr.msk.f32.vlgmr.msra.gmra.mrb[24].mxu0 %vm303_vm3, %v4764_v33 }
 0x52b   :  { %3982 = vmatprep.mubr.msk.f32.mxu0 %vm4541_vm0, %v4542_v4  ;;  %4343 = vmatpush3.bf16.msra.mxu0 %v4342_v22 }
 0x52c   :  { %4007 = vmatprep.subr.mxu0 %v4542_v4 }
 0x52e   :  { %3983 = vmatmul.mubr.msk.f32.gmra.mrb[26].mxu0 %vm303_vm3, %v4774_v38 }
 0x52f   :  { %3985 = vmatprep.mubr.msk.f32.mxu0 %vm4541_vm0, %v4542_v4  ;;  %4008 = vmatpush3.msk.msra.mxu0 %vm371_vm5, %v3552_v24 }
 0x530   :  { %4348 = vmatprep.subr.bf16.mxu0 %v4540_v2 }
 0x532   :  { %3986 = vmatmul.mubr.msk.f32.gmra.mrb[28].mxu0 %vm303_vm3, %v4788_v42 }
 0x533   :  { %4009 = vmatprep.mubr.msk.f32.mxu0 %vm4541_vm0, %v4542_v4 }
 0x536   :  { %4010 = vmatmul.mubr.msk.f32.vlgmr.msra.gmra.mrb[30].mxu0 %vm303_vm3, %v4764_v33 }
 0x537   :  { %4012 = vmatprep.mubr.msk.f32.mxu0 %vm4541_vm0, %v4542_v4 }
 0x53a   :  { %4013 = vmatmul.mubr.msk.f32.gmra.mrb[32].mxu0 %vm303_vm3, %v4774_v38 }
 0x53b   :  { %4015 = vmatprep.mubr.msk.f32.mxu0 %vm4541_vm0, %v4542_v4 }
 0x53e   :  { %4016 = vmatmul.mubr.msk.f32.gmra.mrb[34].mxu0 %vm303_vm3, %v4788_v42 }
 0x53f   :  { %4039 = vmatprep.mubr.msk.f32.mxu0 %vm4541_vm0, %v4542_v4 }
 0x5f1   :  { %v837_v29 = vpop.f32.mrb[18].mxu0 }
 0x5f2   :  { %v3955_v30 = vpop.f32.mrb[19].mxu0  ;;  %3965 = vmatmul.mubr.msk.f32.vlgmr.msra.gmra.mrb[18].mxu1 %vm627_vm6, %v837_v29 }
 0x5f3   :  { %3967 = vmatprep.mubr.msk.f32.mxu1 %vm4541_vm0, %v4542_v4  ;;  %4340 = vmatpush3.bf16.msra.mxu1 %v4339_v28 }
 0x5f4   :  { %3992 = vmatprep.subr.mxu1 %v4542_v4 }
 0x5f5   :  { %v842_v35 = vpop.f32.mrb[20].mxu0 }
 0x5f6   :  { %v3958_v36 = vpop.f32.mrb[21].mxu0  ;;  %3968 = vmatmul.mubr.msk.f32.gmra.mrb[20].mxu1 %vm627_vm6, %v842_v35 }
 0x5f7   :  { %3970 = vmatprep.mubr.msk.f32.mxu1 %vm4541_vm0, %v4542_v4  ;;  %3993 = vmatpush3.msk.msra.mxu1 %vm371_vm5, %v3545_v34  ;;  %v3567_v36 = vld [vmem:[%s5477_s8 + $0x8] sm:$0xff] }
 0x5f8   :  { %4344 = vmatprep.subr.bf16.mxu1 %v4540_v2 }
 0x5f9   :  { %v847_v37 = vpop.f32.mrb[22].mxu0 }
 0x5fa   :  { %v3961_v40 = vpop.f32.mrb[23].mxu0  ;;  %3971 = vmatmul.mubr.msk.f32.gmra.mrb[22].mxu1 %vm627_vm6, %v847_v37 }
 0x5fb   :  { %3994 = vmatprep.mubr.msk.f32.mxu1 %vm4541_vm0, %v4542_v4 }
 0x5fd   :  { %v1017_v41 = vpop.f32.mrb[24].mxu0 }
 0x5fe   :  { %v3981_v44 = vpop.f32.mrb[25].mxu0  ;;  %3995 = vmatmul.mubr.msk.f32.vlgmr.msra.gmra.mrb[24].mxu1 %vm303_vm3, %v4764_v33 }
 0x5ff   :  { %3997 = vmatprep.mubr.msk.f32.mxu1 %vm4541_vm0, %v4542_v4 }
 0x601   :  { %v1022_v45 = vpop.f32.mrb[26].mxu0 }
 0x602   :  { %v3984_v46 = vpop.f32.mrb[27].mxu0  ;;  %3998 = vmatmul.mubr.msk.f32.gmra.mrb[26].mxu1 %vm303_vm3, %v4774_v38 }
 0x603   :  { %4000 = vmatprep.mubr.msk.f32.mxu1 %vm4541_vm0, %v4542_v4 }
 0x605   :  { %v1027_v48 = vpop.f32.mrb[28].mxu0 }
 0x606   :  { %v3987_v49 = vpop.f32.mrb[29].mxu0  ;;  %4001 = vmatmul.mubr.msk.f32.gmra.mrb[28].mxu1 %vm303_vm3, %v4788_v42 }
 0x607   :  { %4024 = vmatprep.mubr.msk.f32.mxu1 %vm4541_vm0, %v4542_v4 }
 0x609   :  { %v1191_v33 = vpop.f32.mrb[30].mxu0 }
 0x60a   :  { %v4011_v50 = vpop.f32.mrb[31].mxu0 }
 0x60d   :  { %v1196_v52 = vpop.f32.mrb[32].mxu0 }
 0x60e   :  { %v4349_v53 = vpack.c.bf16 %v1196_v52, %v1191_v33  ;;  %v4014_v54 = vpop.f32.mrb[33].mxu0 }
 0x610   :  { %4350 = vmatpush3.bf16.msra.mxu0 %v4349_v53 }
 0x611   :  { %v1201_v55 = vpop.f32.mrb[34].mxu0  ;;  %4037 = vmatprep.subr.mxu0 %v4542_v4 }
 0x612   :  { %v4017_v38 = vpop.f32.mrb[35].mxu0 }
 0x614   :  { %4038 = vmatpush3.msk.msra.mxu0 %vm371_vm5, %v1201_v55 }
 0x615   :  { %4351 = vmatprep.subr.bf16.mxu0 %v4540_v2 }
 0x6d1   :  { %v1104_v56 = vpop.f32.mrb[24].mxu1 }
 0x6d2   :  { %v3996_v57 = vpop.f32.mrb[25].mxu1 }
 0x6d5   :  { %v1109_v42 = vpop.f32.mrb[26].mxu1 }
 0x6d6   :  { %v4345_v58 = vpack.c.bf16 %v1109_v42, %v1104_v56  ;;  %v3999_v59 = vpop.f32.mrb[27].mxu1 }
 0x6d8   :  { %4347 = vmatpush3.bf16.xpose.msk.msra.mxu1 %vm4814_vm7, %v4345_v58 }
 0x6d9   :  { %v1114_v60 = vpop.f32.mrb[28].mxu1  ;;  %4022 = vmatprep.subr.mxu1 %v4542_v4 }
 0x6da   :  { %v4002_v61 = vpop.f32.mrb[29].mxu1 }
 0x6e0   :  { %4023 = vmatpush3.xpose.msk.msra.mxu1 %vm627_vm6, %v1114_v60 }
 0x6e1   :  { %4048 = vmatprep.subr.mxu1 %v4542_v4 }
 0x6e3   :  { %4025 = vmatmul.mubr.msk.f32.vlgmr.msra.gmra.mrb[30].mxu1 %vm627_vm6, %v1017_v41 }
 0x6e4   :  { %4027 = vmatprep.mubr.msk.f32.mxu1 %vm4541_vm0, %v4542_v4  ;;  %4049 = vmatpush3.msra.mxu1 %v3567_v36 }
 0x6e5   :  { %4354 = vmatprep.subr.bf16.mxu1 %v4540_v2 }
 0x6e7   :  { %4028 = vmatmul.mubr.msk.f32.gmra.mrb[32].mxu1 %vm627_vm6, %v1022_v45 }
 0x6e8   :  { %4030 = vmatprep.mubr.msk.f32.mxu1 %vm4541_vm0, %v4542_v4 }
 0x6eb   :  { %4031 = vmatmul.mubr.msk.f32.gmra.mrb[34].mxu1 %vm627_vm6, %v1027_v48 }
 0x6ec   :  { %4050 = vmatprep.mubr.msk.f32.mxu1 %vm4541_vm0, %v4542_v4 }
 0x7b6   :  { %v1289_v62 = vpop.f32.mrb[30].mxu1 }
 0x7b7   :  { %v1290_v63 = vadd.f32 %v1289_v62, %v4844_v26  ;;  %v4026_v0 = vpop.f32.mrb[31].mxu1 }
 0x7b9   :  { %v1303_v1 = vsel %vm303_vm3, %v1290_v63, -inf }
 0x7ba   :  { %1304 = vmax.xlane.f32.xlu0 %v1303_v1  ;;  %v1294_v3 = vpop.f32.mrb[32].mxu1 }
 0x7bb   :  { %v1295_v6 = vadd.f32 %v1294_v3, %v4848_v32  ;;  %v4029_v7 = vpop.f32.mrb[33].mxu1 }
 0x7bd   :  { %v1306_v8 = vsel %vm303_vm3, %v1295_v6, -inf }
 0x7be   :  { %1307 = vmax.xlane.f32.xlu1 %v1306_v8  ;;  %v1299_v9 = vpop.f32.mrb[34].mxu1 }
 0x7bf   :  { %v1300_v10 = vadd.f32 %v1299_v9, %v4853_v39  ;;  %v4032_v11 = vpop.f32.mrb[35].mxu1 }
 0x7c1   :  { %v1309_v13 = vsel %vm310_vm4, %v1300_v10, -inf }
 0x7c2   :  { %1310 = vmax.xlane.f32.xlu0 %v1309_v13 }
 0x847   :  { %v1305_v14 = vpop.xlane.xlu0 %1304 }
 0x848   :  { %v1312_v15 = vsub.f32 %v1290_v63, %v1305_v14 }
 0x84a   :  { %v1315_v17 = vmul.f32 1.442695, %v1312_v15 }
 0x84b   :  { %v1308_v18 = vpop.xlane.xlu1 %1307 }
 0x84c   :  { %4448 = vpow2.f32 %v1315_v17  ;;  %v1313_v12 = vsub.f32 %v1295_v6, %v1308_v18 }
 0x84e   :  { %v1317_v21 = vmul.f32 1.442695, %v1313_v12 }
 0x84f   :  { %v1311_v22 = vpop.xlane.xlu0 %1310 }
 0x850   :  { %4450 = vpow2.f32 %v1317_v21  ;;  %v1314_v24 = vsub.f32 %v1300_v10, %v1311_v22  ;;  %v1576_v21 = vld [vmem:[%s5479_s10] sm:$0xff]  ;;  %v1577_v22 = vld [vmem:[%s5479_s10 + $0x8] sm:$0xff] }
 0x852   :  { %v1319_v25 = vmul.f32 1.442695, %v1314_v24  ;;  %v4352_v24 = vpack.c.bf16 %v1577_v22, %v1576_v21 }
 0x854   :  { %4452 = vpow2.f32 %v1319_v25  ;;  %v1578_v25 = vld [vmem:[%s5479_s10 + $0x10] sm:$0xf] }
 0x856   :  { %v4449_v27 = vpop.eup %4448 }
 0x857   :  { %v1321_v28 = vsel %vm303_vm3, %v4449_v27, 0.0 }
 0x858   :  { %1322 = vadd.xlane.f32.xlu1 %v1321_v28 }
 0x85a   :  { %v4451_v29 = vpop.eup %4450 }
 0x85b   :  { %v1324_v30 = vsel %vm303_vm3, %v4451_v29, 0.0 }
 0x85c   :  { %1325 = vadd.xlane.f32.xlu0 %v1324_v30 }
 0x85e   :  { %v4453_v34 = vpop.eup %4452 }
 0x85f   :  { %v1327_v35 = vsel %vm310_vm4, %v4453_v34, 0.0 }
 0x860   :  { %1328 = vadd.xlane.f32.xlu1 %v1327_v35 }
 0x8e5   :  { %v1323_v37 = vpop.xlane.xlu1 %1322 }
 0x8e6   :  { %4454 = vrcp.f32 %v1323_v37 }
 0x8e9   :  { %v1326_v40 = vpop.xlane.xlu0 %1325 }
 0x8ea   :  { %4456 = vrcp.f32 %v1326_v40  ;;  %v1522_v40 = vld [vmem:[%s5478_s9] sm:$0x3] }
 0x8ed   :  { %v1329_v41 = vpop.xlane.xlu1 %1328 }
 0x8ee   :  { %4458 = vrcp.f32 %v1329_v41 }
 0x8f0   :  { %v4455_v44 = vpop.eup %4454 }
 0x8f1   :  { %v1333_v45 = vmul.f32 %v4455_v44, %v4449_v27  ;;  %v1565_v44 = vrot.slane %v1522_v40, %v4748_v20 }
 0x8f3   :  { %4040 = vmatmul.mubr.msk.f32.vlgmr.msra.gmra.mrb[36].mxu0 %vm303_vm3, %v1333_v45 }
 0x8f4   :  { %v4457_v46 = vpop.eup %4456  ;;  %4042 = vmatprep.mubr.msk.f32.mxu0 %vm4541_vm0, %v4542_v4  ;;  %4353 = vmatpush3.bf16.msra.mxu0 %v4352_v24 }
 0x8f5   :  { %v1334_v48 = vmul.f32 %v4457_v46, %v4451_v29  ;;  %4063 = vmatprep.subr.mxu0 %v4542_v4  ;;  %v1572_v46 = vrot.slane %v1522_v40, %v4754_v23 }
 0x8f7   :  { %4043 = vmatmul.mubr.msk.f32.gmra.mrb[38].mxu0 %vm303_vm3, %v1334_v48 }
 0x8f8   :  { %v4459_v49 = vpop.eup %4458  ;;  %4045 = vmatprep.mubr.msk.f32.mxu0 %vm4541_vm0, %v4542_v4  ;;  %4064 = vmatpush3.msk.msra.mxu0 %vm371_vm5, %v1578_v25 }
 0x8f9   :  { %v1335_v33 = vmul.f32 %v4459_v49, %v4453_v34  ;;  %4360 = vmatprep.subr.bf16.mxu0 %v4540_v2 }
 0x8fb   :  { %4046 = vmatmul.mubr.msk.f32.gmra.mrb[40].mxu0 %vm303_vm3, %v1335_v33 }
 0x8fc   :  { %4065 = vmatprep.mubr.msk.f32.mxu0 %vm4541_vm0, %v4542_v4 }
 0x9c6   :  { %v1414_v50 = vpop.f32.mrb[36].mxu0 }
 0x9c7   :  { %v4041_v52 = vpop.f32.mrb[37].mxu0  ;;  %4051 = vmatmul.mubr.msk.f32.vlgmr.msra.gmra.mrb[18].mxu1 %vm627_vm6, %v1414_v50 }
 0x9c8   :  { %4053 = vmatprep.mubr.msk.f32.mxu1 %vm4541_vm0, %v4542_v4 }
 0x9ca   :  { %v1419_v53 = vpop.f32.mrb[38].mxu0 }
 0x9cb   :  { %v4044_v54 = vpop.f32.mrb[39].mxu0  ;;  %4054 = vmatmul.mubr.msk.f32.gmra.mrb[20].mxu1 %vm627_vm6, %v1419_v53 }
 0x9cc   :  { %4056 = vmatprep.mubr.msk.f32.mxu1 %vm4541_vm0, %v4542_v4 }
 0x9ce   :  { %v1424_v55 = vpop.f32.mrb[40].mxu0 }
 0x9cf   :  { %v4047_v38 = vpop.f32.mrb[41].mxu0  ;;  %4057 = vmatmul.mubr.msk.f32.gmra.mrb[22].mxu1 %vm627_vm6, %v1424_v55 }
 0x9d0   :  { %4082 = vmatprep.mubr.msk.f32.mxu1 %vm4541_vm0, %v4542_v4 }
 0xa9a   :  { %v1505_v56 = vpop.f32.mrb[18].mxu1 }
 0xa9b   :  { %v5004_v57 = vadd.f32 %v1505_v56, %v4696_v31  ;;  %v4052_v42 = vpop.f32.mrb[19].mxu1 }
 0xa9d   :  { %v1523_v58 = vsel %vm303_vm3, %v5004_v57, 0.0 }
 0xa9e   :  { %1524 = vadd.xlane.f32.xlu0 %v1523_v58  ;;  %v1510_v59 = vpop.f32.mrb[20].mxu1  ;;  %v1693_v58 = vld [vmem:[%s5481_s12] sm:$0xff] }
 0xa9f   :  { %v5009_v60 = vadd.f32 %v1510_v59, %v4703_v43  ;;  %v4055_v61 = vpop.f32.mrb[21].mxu1  ;;  %v1694_v59 = vld [vmem:[%s5481_s12 + $0x8] sm:$0xff] }
 0xaa0   :  { %v4355_v61 = vpack.c.bf16 %v1694_v59, %v1693_v58 }
 0xaa1   :  { %v1526_v62 = vsel %vm303_vm3, %v5009_v60, 0.0 }
 0xaa2   :  { %1527 = vadd.xlane.f32.xlu1 %v1526_v62  ;;  %v1515_v63 = vpop.f32.mrb[22].mxu1  ;;  %4356 = vmatpush3.bf16.msra.mxu1 %v4355_v61  ;;  %v1695_v62 = vld [vmem:[%s5481_s12 + $0x10] sm:$0xff] }
 0xaa3   :  { %v5014_v0 = vadd.f32 %v1515_v63, %v4710_v47  ;;  %v4058_v31 = vpop.f32.mrb[23].mxu1  ;;  %4357 = vmatprep.subr.bf16.mxu1 %v4540_v2  ;;  %v1696_v63 = vld [vmem:[%s5481_s12 + $0x18] sm:$0xff] }
 0xaa4   :  { %v4358_v31 = vpack.c.bf16 %v1696_v63, %v1695_v62 }
 0xaa5   :  { %v1529_v1 = vsel %vm310_vm4, %v5014_v0, 0.0 }
 0xaa6   :  { %1530 = vadd.xlane.f32.xlu0 %v1529_v1  ;;  %4359 = vmatpush3.bf16.msra.mxu1 %v4358_v31  ;;  %v3571_v1 = vld [vmem:[%s5480_s11] ss:$0 sm:$0xff] }
 0xaa7   :  { %4363 = vmatprep.subr.bf16.mxu1 %v4540_v2 }
 0xb2b   :  { %v1525_v3 = vpop.xlane.xlu0 %1524 }
 0xb2c   :  { %v1532_v6 = vmul.f32 0.05, %v1525_v3 }
 0xb2e   :  { %v1535_v7 = vsub.f32 %v5004_v57, %v1532_v6 }
 0xb2f   :  { %v1528_v43 = vpop.xlane.xlu1 %1527 }
 0xb30   :  { %v1533_v8 = vmul.f32 0.05, %v1528_v43  ;;  %v1538_v9 = vmul.f32 %v1535_v7, %v1535_v7 }
 0xb32   :  { %v1536_v10 = vsub.f32 %v5009_v60, %v1533_v8  ;;  %v1541_v11 = vsel %vm303_vm3, %v1538_v9, 0.0 }
 0xb33   :  { %1542 = vadd.xlane.f32.xlu1 %v1541_v11  ;;  %v1531_v13 = vpop.xlane.xlu0 %1530 }
 0xb34   :  { %v1534_v47 = vmul.f32 0.05, %v1531_v13  ;;  %v1539_v14 = vmul.f32 %v1536_v10, %v1536_v10 }
 0xb36   :  { %v1537_v15 = vsub.f32 %v5014_v0, %v1534_v47  ;;  %v1544_v17 = vsel %vm303_vm3, %v1539_v14, 0.0 }
 0xb37   :  { %1545 = vadd.xlane.f32.xlu0 %v1544_v17 }
 0xb38   :  { %v1540_v18 = vmul.f32 %v1537_v15, %v1537_v15 }
 0xb3a   :  { %v1547_v12 = vsel %vm310_vm4, %v1540_v18, 0.0 }
 0xb3b   :  { %1548 = vadd.xlane.f32.xlu1 %v1547_v12 }
 0xbc0   :  { %v1543_v27 = vpop.xlane.xlu1 %1542 }
 0xbc1   :  { %v1550_v28 = vmul.f32 0.05, %v1543_v27 }
 0xbc3   :  { %v1553_v29 = vadd.f32 1e-05, %v1550_v28 }
 0xbc4   :  { %v1546_v30 = vpop.xlane.xlu0 %1545 }
 0xbc5   :  { %4460 = vrsqrt.f32 %v1553_v29  ;;  %v1551_v34 = vmul.f32 0.05, %v1546_v30 }
 0xbc7   :  { %v1554_v35 = vadd.f32 1e-05, %v1551_v34 }
 0xbc8   :  { %v1549_v36 = vpop.xlane.xlu1 %1548 }
 0xbc9   :  { %4462 = vrsqrt.f32 %v1554_v35  ;;  %v1552_v37 = vmul.f32 0.05, %v1549_v36  ;;  %v3576_v35 = vld [vmem:[%s5482_s13] ss:$0 sm:$0xff] }
 0xbcb   :  { %v1555_v41 = vadd.f32 1e-05, %v1552_v37 }
 0xbcd   :  { %4464 = vrsqrt.f32 %v1555_v41 }
 0xbcf   :  { %v4461_v45 = vpop.eup %4460 }
 0xbd0   :  { %v1559_v48 = vmul.f32 %v4461_v45, %v1535_v7 }
 0xbd2   :  { %v1566_v49 = vmul.f32 %v1565_v44, %v1559_v48 }
 0xbd3   :  { %v4463_v33 = vpop.eup %4462 }
 0xbd4   :  { %v1573_v50 = vadd.f32 %v1572_v46, %v1566_v49  ;;  %v1560_v52 = vmul.f32 %v4463_v33, %v1536_v10 }
 0xbd6   :  { %4066 = vmatmul.mubr.msk.f32.vlgmr.msra.gmra.mrb[42].mxu0 %vm303_vm3, %v1573_v50  ;;  %v1567_v53 = vmul.f32 %v1565_v44, %v1560_v52 }
 0xbd7   :  { %v4465_v54 = vpop.eup %4464  ;;  %4068 = vmatprep.mubr.msk.f32.mxu0 %vm4541_vm0, %v4542_v4 }
 0xbd8   :  { %v1574_v55 = vadd.f32 %v1572_v46, %v1567_v53  ;;  %v1561_v38 = vmul.f32 %v4465_v54, %v1537_v15 }
 0xbda   :  { %4069 = vmatmul.mubr.msk.f32.gmra.mrb[44].mxu0 %vm303_vm3, %v1574_v55  ;;  %v1568_v56 = vmul.f32 %v1565_v44, %v1561_v38 }
 0xbdb   :  { %4071 = vmatprep.mubr.msk.f32.mxu0 %vm4541_vm0, %v4542_v4 }
 0xbdc   :  { %v1575_v42 = vadd.f32 %v1572_v46, %v1568_v56 }
 0xbde   :  { %4072 = vmatmul.mubr.msk.f32.gmra.mrb[46].mxu0 %vm303_vm3, %v1575_v42 }
 0xbdf   :  { %4097 = vmatprep.mubr.msk.f32.mxu0 %vm4541_vm0, %v4542_v4 }
 0xca9   :  { %v1664_v3 = vpop.f32.mrb[42].mxu0 }
 0xcaa   :  { %v1665_v6 = vadd.f32 %v3571_v1, %v1664_v3  ;;  %v4067_v7 = vpop.f32.mrb[43].mxu0 }
 0xcab   :  { %v3581_v7 = vld [vmem:[%s5474_s5 + $0x30] sm:$0xff] }
 0xcac   :  { %v1681_v43 = vmul.f32 0.70710677, %v1665_v6  ;;  %v1678_v18 = vmul.f32 0.5, %v1665_v6 }
 0xcad   :  { %v1669_v8 = vpop.f32.mrb[44].mxu0 }
 0xcae   :  { %4466 = verf.f32 %v1681_v43  ;;  %v1670_v9 = vadd.f32 %v3571_v1, %v1669_v8  ;;  %v4070_v10 = vpop.f32.mrb[45].mxu0  ;;  %v3582_v43 = vld [vmem:[%s5474_s5 + $0x38] sm:$0xff]  ;;  %v3588_v8 = vld [vmem:[%s5475_s6 + $0x30] sm:$0xff] }
 0xcaf   :  { %v3589_v10 = vld [vmem:[%s5475_s6 + $0x38] sm:$0xff] }
 0xcb0   :  { %v1682_v11 = vmul.f32 0.70710677, %v1670_v9  ;;  %v1679_v24 = vmul.f32 0.5, %v1670_v9  ;;  %v4361_v9 = vpack.c.bf16 %v3582_v43, %v3581_v7 }
 0xcb1   :  { %v1674_v13 = vpop.f32.mrb[46].mxu0 }
 0xcb2   :  { %4468 = verf.f32 %v1682_v11  ;;  %v1675_v47 = vadd.f32 %v3571_v1, %v1674_v13  ;;  %v4073_v14 = vpop.f32.mrb[47].mxu0  ;;  %v4364_v11 = vpack.c.bf16 %v3589_v10, %v3588_v8  ;;  %4362 = vmatpush3.bf16.msra.mxu0 %v4361_v9  ;;  %v3583_v13 = vld [vmem:[%s5474_s5 + $0x40] sm:$0xf] }
 0xcb3   :  { %4095 = vmatprep.subr.mxu0 %v4542_v4 }
 0xcb4   :  { %v1683_v15 = vmul.f32 0.70710677, %v1675_v47  ;;  %v1680_v29 = vmul.f32 0.5, %v1675_v47  ;;  %v3590_v47 = vld [vmem:[%s5475_s6 + $0x40] sm:$0xf] }
 0xcb6   :  { %4470 = verf.f32 %v1683_v15  ;;  %4096 = vmatpush3.msk.msra.mxu0 %vm371_vm5, %v3583_v13 }
 0xcb7   :  { %4366 = vmatprep.subr.bf16.mxu0 %v4540_v2 }
 0xcb8   :  { %v4467_v17 = vpop.eup %4466 }
 0xcb9   :  { %v1687_v12 = vadd.f32 1.0, %v4467_v17 }
 0xcbb   :  { %v1690_v21 = vmul.f32 %v1687_v12, %v1678_v18 }
 0xcbc   :  { %v4469_v22 = vpop.eup %4468 }
 0xcbd   :  { %v1688_v25 = vadd.f32 1.0, %v4469_v22  ;;  %4083 = vmatmul.mubr.msk.f32.vlgmr.msra.gmra.mrb[36].mxu1 %vm1704_vm11, %v1690_v21 }
 0xcbe   :  { %4085 = vmatprep.mubr.msk.f32.mxu1 %vm4541_vm0, %v4542_v4  ;;  %4365 = vmatpush3.bf16.msra.mxu1 %v4364_v11 }
 0xcbf   :  { %v1691_v27 = vmul.f32 %v1688_v25, %v1679_v24  ;;  %4110 = vmatprep.subr.mxu1 %v4542_v4  ;;  %v3580_v25 = vld [vmem:[%s5473_s4 + $0x2] sm:$0x3] }
 0xcc0   :  { %v4471_v28 = vpop.eup %4470 }
 0xcc1   :  { %v1689_v30 = vadd.f32 1.0, %v4471_v28  ;;  %4086 = vmatmul.mubr.msk.f32.gmra.mrb[38].mxu1 %vm1704_vm11, %v1691_v27  ;;  %v1841_v28 = vrot.slane %v3580_v25, %v4748_v20 }
 0xcc2   :  { %4088 = vmatprep.mubr.msk.f32.mxu1 %vm4541_vm0, %v4542_v4  ;;  %4111 = vmatpush3.msk.msra.mxu1 %vm371_vm5, %v3590_v47 }
 0xcc3   :  { %v1692_v34 = vmul.f32 %v1689_v30, %v1680_v29  ;;  %4369 = vmatprep.subr.bf16.mxu1 %v4540_v2  ;;  %v1848_v30 = vrot.slane %v3580_v25, %v4754_v23 }
 0xcc5   :  { %4089 = vmatmul.mubr.msk.f32.gmra.mrb[40].mxu1 %vm1704_vm11, %v1692_v34 }
 0xcc6   :  { %4112 = vmatprep.mubr.msk.f32.mxu1 %vm4541_vm0, %v4542_v4 }
 0xd90   :  { %v1780_v36 = vpop.f32.mrb[36].mxu1 }
 0xd91   :  { %v1781_v37 = vadd.f32 %v3576_v35, %v1780_v36  ;;  %v4084_v40 = vpop.f32.mrb[37].mxu1  ;;  %v3596_v36 = vld [vmem:[%s5476_s7 + $0x38] sm:$0xff] }
 0xd93   :  { %v5080_v41 = vadd.f32 %v5004_v57, %v1781_v37 }
 0xd94   :  { %v1785_v44 = vpop.f32.mrb[38].mxu1 }
 0xd95   :  { %v1786_v45 = vadd.f32 %v3576_v35, %v1785_v44  ;;  %v4087_v46 = vpop.f32.mrb[39].mxu1  ;;  %v1799_v48 = vsel %vm303_vm3, %v5080_v41, 0.0 }
 0xd96   :  { %1800 = vadd.xlane.f32.xlu0 %v1799_v48 }
 0xd97   :  { %v5085_v49 = vadd.f32 %v5009_v60, %v1786_v45 }
 0xd98   :  { %v1790_v33 = vpop.f32.mrb[40].mxu1 }
 0xd99   :  { %v1791_v50 = vadd.f32 %v3576_v35, %v1790_v33  ;;  %v4090_v52 = vpop.f32.mrb[41].mxu1  ;;  %v1802_v53 = vsel %vm303_vm3, %v5085_v49, 0.0  ;;  %v3595_v35 = vld [vmem:[%s5476_s7 + $0x30] sm:$0xff] }
 0xd9a   :  { %1803 = vadd.xlane.f32.xlu1 %v1802_v53  ;;  %v4367_v46 = vpack.c.bf16 %v3596_v36, %v3595_v35  ;;  %v3597_v53 = vld [vmem:[%s5476_s7 + $0x40] sm:$0xf] }
 0xd9b   :  { %v5090_v57 = vadd.f32 %v5014_v0, %v1791_v50 }
 0xd9d   :  { %v1805_v54 = vsel %vm310_vm4, %v5090_v57, 0.0 }
 0xd9e   :  { %1806 = vadd.xlane.f32.xlu0 %v1805_v54 }
 0xe23   :  { %v1801_v55 = vpop.xlane.xlu0 %1800 }
 0xe24   :  { %v1808_v38 = vmul.f32 0.05, %v1801_v55 }
 0xe26   :  { %v1811_v56 = vsub.f32 %v5080_v41, %v1808_v38 }
 0xe27   :  { %v1804_v60 = vpop.xlane.xlu1 %1803 }
 0xe28   :  { %v1809_v42 = vmul.f32 0.05, %v1804_v60  ;;  %v1814_v58 = vmul.f32 %v1811_v56, %v1811_v56 }
 0xe2a   :  { %v1812_v59 = vsub.f32 %v5085_v49, %v1809_v42  ;;  %v1817_v61 = vsel %vm303_vm3, %v1814_v58, 0.0 }
 0xe2b   :  { %1818 = vadd.xlane.f32.xlu1 %v1817_v61  ;;  %v1807_v62 = vpop.xlane.xlu0 %1806 }
 0xe2c   :  { %v1810_v63 = vmul.f32 0.05, %v1807_v62  ;;  %v1815_v0 = vmul.f32 %v1812_v59, %v1812_v59 }
 0xe2e   :  { %v1813_v31 = vsub.f32 %v5090_v57, %v1810_v63  ;;  %v1820_v1 = vsel %vm303_vm3, %v1815_v0, 0.0 }
 0xe2f   :  { %1821 = vadd.xlane.f32.xlu0 %v1820_v1 }
 0xe30   :  { %v1816_v3 = vmul.f32 %v1813_v31, %v1813_v31 }
 0xe32   :  { %v1823_v6 = vsel %vm310_vm4, %v1816_v3, 0.0 }
 0xe33   :  { %1824 = vadd.xlane.f32.xlu1 %v1823_v6 }
 0xeb8   :  { %v1819_v14 = vpop.xlane.xlu1 %1818 }
 0xeb9   :  { %v1826_v15 = vmul.f32 0.05, %v1819_v14 }
 0xebb   :  { %v1829_v17 = vadd.f32 1e-05, %v1826_v15 }
 0xebc   :  { %v1822_v18 = vpop.xlane.xlu0 %1821 }
 0xebd   :  { %4472 = vrsqrt.f32 %v1829_v17  ;;  %v1827_v12 = vmul.f32 0.05, %v1822_v18 }
 0xebf   :  { %v1830_v21 = vadd.f32 1e-05, %v1827_v12 }
 0xec0   :  { %v1825_v22 = vpop.xlane.xlu1 %1824 }
 0xec1   :  { %4474 = vrsqrt.f32 %v1830_v21  ;;  %v1828_v24 = vmul.f32 0.05, %v1825_v22 }
 0xec3   :  { %v1831_v27 = vadd.f32 1e-05, %v1828_v24 }
 0xec5   :  { %4476 = vrsqrt.f32 %v1831_v27 }
 0xec7   :  { %v4473_v29 = vpop.eup %4472 }
 0xec8   :  { %v1835_v34 = vmul.f32 %v4473_v29, %v1811_v56 }
 0xeca   :  { %v1842_v37 = vmul.f32 %v1841_v28, %v1835_v34 }
 0xecb   :  { %v4475_v40 = vpop.eup %4474 }
 0xecc   :  { %v5135_v44 = vadd.f32 %v1848_v30, %v1842_v37  ;;  %v1836_v45 = vmul.f32 %v4475_v40, %v1812_v59 }
 0xece   :  { %v1843_v48 = vmul.f32 %v1841_v28, %v1836_v45  ;;  %4098 = vmatmul.mubr.msk.f32.vlgmr.msra.gmra.mrb[48].mxu0 %vm303_vm3, %v5135_v44  ;;  %4113 = vmatmul.mubr.msk.f32.vlgmr.msra.gmra.mrb[42].mxu1 %vm303_vm3, %v5135_v44 }
 0xecf   :  { %v4477_v33 = vpop.eup %4476  ;;  %4100 = vmatprep.mubr.msk.f32.mxu0 %vm4541_vm0, %v4542_v4  ;;  %4115 = vmatprep.mubr.msk.f32.mxu1 %vm4541_vm0, %v4542_v4 }
 0xed0   :  { %v5145_v50 = vadd.f32 %v1848_v30, %v1843_v48  ;;  %v1837_v52 = vmul.f32 %v4477_v33, %v1813_v31  ;;  %4368 = vmatpush3.bf16.msra.mxu0 %v4367_v46 }
 0xed1   :  { %4125 = vmatprep.subr.mxu0 %v4542_v4 }
 0xed2   :  { %v1844_v54 = vmul.f32 %v1841_v28, %v1837_v52  ;;  %4101 = vmatmul.mubr.msk.f32.gmra.mrb[50].mxu0 %vm303_vm3, %v5145_v50  ;;  %4116 = vmatmul.mubr.msk.f32.gmra.mrb[44].mxu1 %vm303_vm3, %v5145_v50 }
 0xed3   :  { %4103 = vmatprep.mubr.msk.f32.mxu0 %vm4541_vm0, %v4542_v4  ;;  %4118 = vmatprep.mubr.msk.f32.mxu1 %vm4541_vm0, %v4542_v4 }
 0xed4   :  { %v5159_v55 = vadd.f32 %v1848_v30, %v1844_v54  ;;  %4126 = vmatpush3.msk.msra.mxu0 %vm371_vm5, %v3597_v53 }
 0xed5   :  { %4373 = vmatprep.subr.bf16.mxu0 %v4540_v2 }
 0xed6   :  { %4104 = vmatmul.mubr.msk.f32.gmra.mrb[52].mxu0 %vm303_vm3, %v5159_v55  ;;  %4119 = vmatmul.mubr.msk.f32.gmra.mrb[46].mxu1 %vm303_vm3, %v5159_v55 }
 0xed7   :  { %4127 = vmatprep.mubr.msk.f32.mxu0 %vm4541_vm0, %v4542_v4  ;;  %4142 = vmatprep.mubr.msk.f32.mxu1 %vm4541_vm0, %v4542_v4 }
 0xeda   :  { %4128 = vmatmul.mubr.msk.f32.vlgmr.msra.gmra.mrb[54].mxu0 %vm303_vm3, %v5135_v44 }
 0xedb   :  { %4130 = vmatprep.mubr.msk.f32.mxu0 %vm4541_vm0, %v4542_v4 }
 0xede   :  { %4131 = vmatmul.mubr.msk.f32.gmra.mrb[56].mxu0 %vm303_vm3, %v5145_v50 }
 0xedf   :  { %4133 = vmatprep.mubr.msk.f32.mxu0 %vm4541_vm0, %v4542_v4 }
 0xee2   :  { %4134 = vmatmul.mubr.msk.f32.gmra.mrb[58].mxu0 %vm303_vm3, %v5159_v55 }
 0xee3   :  { %4157 = vmatprep.mubr.msk.f32.mxu0 %vm4541_vm0, %v4542_v4 }
 0xfa1   :  { %v1934_v38 = vpop.f32.mrb[48].mxu0  ;;  %v2021_v56 = vpop.f32.mrb[42].mxu1 }
 0xfa2   :  { %v4099_v60 = vpop.f32.mrb[49].mxu0  ;;  %v4114_v42 = vpop.f32.mrb[43].mxu1 }
 0xfa5   :  { %v1939_v58 = vpop.f32.mrb[50].mxu0  ;;  %v2026_v59 = vpop.f32.mrb[44].mxu1 }
 0xfa6   :  { %v4370_v61 = vpack.c.bf16 %v2026_v59, %v2021_v56  ;;  %v4102_v62 = vpop.f32.mrb[51].mxu0  ;;  %v4117_v63 = vpop.f32.mrb[45].mxu1  ;;  %v3617_v59 = vld [vmem:[%s5474_s5 + $0x50] sm:$0xff] }
 0xfa8   :  { %4372 = vmatpush3.bf16.xpose.msk.msra.mxu1 %vm4814_vm7, %v4370_v61 }
 0xfa9   :  { %v1944_v0 = vpop.f32.mrb[52].mxu0  ;;  %v2031_v31 = vpop.f32.mrb[46].mxu1  ;;  %4140 = vmatprep.subr.mxu1 %v4542_v4 }
 0xfaa   :  { %v4105_v1 = vpop.f32.mrb[53].mxu0  ;;  %v4120_v3 = vpop.f32.mrb[47].mxu1 }
 0xfab   :  { %v3618_v1 = vld [vmem:[%s5474_s5 + $0x58] sm:$0xf] }
 0xfad   :  { %v2108_v6 = vpop.f32.mrb[54].mxu0 }
 0xfae   :  { %v4129_v7 = vpop.f32.mrb[55].mxu0 }
 0xfaf   :  { %v3630_v7 = vld [vmem:[%s5476_s7 + $0x48] sm:$0xff] }
 0xfb0   :  { %4141 = vmatpush3.xpose.msk.msra.mxu1 %vm627_vm6, %v2031_v31 }
 0xfb1   :  { %v2113_v43 = vpop.f32.mrb[56].mxu0  ;;  %4166 = vmatprep.subr.mxu1 %v4542_v4 }
 0xfb2   :  { %v4374_v8 = vpack.c.bf16 %v2113_v43, %v2108_v6  ;;  %v4132_v9 = vpop.f32.mrb[57].mxu0  ;;  %v3631_v43 = vld [vmem:[%s5476_s7 + $0x50] sm:$0xff] }
 0xfb3   :  { %4143 = vmatmul.mubr.msk.f32.vlgmr.msra.gmra.mrb[48].mxu1 %vm627_vm6, %v1934_v38  ;;  %v3612_v38 = vld [vmem:[%s5477_s8 + $0x10] sm:$0xff]  ;;  %v3632_v9 = vld [vmem:[%s5476_s7 + $0x58] sm:$0xf] }
 0xfb4   :  { %4375 = vmatpush3.bf16.msra.mxu0 %v4374_v8  ;;  %4145 = vmatprep.mubr.msk.f32.mxu1 %vm4541_vm0, %v4542_v4  ;;  %v4383_v8 = vpack.c.bf16 %v3631_v43, %v3630_v7 }
 0xfb5   :  { %v2118_v10 = vpop.f32.mrb[58].mxu0  ;;  %4155 = vmatprep.subr.mxu0 %v4542_v4  ;;  %4167 = vmatpush3.msra.mxu1 %v3612_v38 }
 0xfb6   :  { %v4135_v11 = vpop.f32.mrb[59].mxu0  ;;  %4379 = vmatprep.subr.bf16.mxu1 %v4540_v2 }
 0xfb7   :  { %4146 = vmatmul.mubr.msk.f32.gmra.mrb[50].mxu1 %vm627_vm6, %v1939_v58  ;;  %v3616_v58 = vld [vmem:[%s5474_s5 + $0x48] sm:$0xff]  ;;  %v3624_v11 = vld [vmem:[%s5475_s6 + $0x50] sm:$0xff] }
 0xfb8   :  { %4156 = vmatpush3.msk.msra.mxu0 %vm371_vm5, %v2118_v10  ;;  %4148 = vmatprep.mubr.msk.f32.mxu1 %vm4541_vm0, %v4542_v4  ;;  %v4377_v62 = vpack.c.bf16 %v3617_v59, %v3616_v58  ;;  %v3623_v10 = vld [vmem:[%s5475_s6 + $0x48] sm:$0xff] }
 0xfb9   :  { %4376 = vmatprep.subr.bf16.mxu0 %v4540_v2 }
 0xfbb   :  { %4149 = vmatmul.mubr.msk.f32.gmra.mrb[52].mxu1 %vm627_vm6, %v1944_v0 }
 0xfbc   :  { %4168 = vmatprep.mubr.msk.f32.mxu1 %vm4541_vm0, %v4542_v4 }
0x1086   :  { %v2206_v13 = vpop.f32.mrb[48].mxu1 }
0x1087   :  { %v2207_v47 = vadd.f32 %v2206_v13, %v4844_v26  ;;  %v4144_v14 = vpop.f32.mrb[49].mxu1  ;;  %v4380_v13 = vpack.c.bf16 %v3624_v11, %v3623_v10 }
0x1089   :  { %v2220_v15 = vsel %vm303_vm3, %v2207_v47, -inf }
0x108a   :  { %2221 = vmax.xlane.f32.xlu0 %v2220_v15  ;;  %v2211_v17 = vpop.f32.mrb[50].mxu1  ;;  %v3625_v15 = vld [vmem:[%s5475_s6 + $0x58] sm:$0xf] }
0x108b   :  { %v2212_v18 = vadd.f32 %v2211_v17, %v4848_v32  ;;  %v4147_v12 = vpop.f32.mrb[51].mxu1 }
0x108d   :  { %v2223_v21 = vsel %vm303_vm3, %v2212_v18, -inf }
0x108e   :  { %2224 = vmax.xlane.f32.xlu1 %v2223_v21  ;;  %v2216_v22 = vpop.f32.mrb[52].mxu1 }
0x108f   :  { %v2217_v24 = vadd.f32 %v2216_v22, %v4853_v39  ;;  %v4150_v25 = vpop.f32.mrb[53].mxu1 }
0x1091   :  { %v2226_v27 = vsel %vm310_vm4, %v2217_v24, -inf }
0x1092   :  { %2227 = vmax.xlane.f32.xlu0 %v2226_v27 }
0x1117   :  { %v2222_v28 = vpop.xlane.xlu0 %2221 }
0x1118   :  { %v2229_v29 = vsub.f32 %v2207_v47, %v2222_v28 }
0x111a   :  { %v2232_v30 = vmul.f32 1.442695, %v2229_v29 }
0x111b   :  { %v2225_v34 = vpop.xlane.xlu1 %2224 }
0x111c   :  { %4478 = vpow2.f32 %v2232_v30  ;;  %v2230_v35 = vsub.f32 %v2212_v18, %v2225_v34 }
0x111e   :  { %v2234_v36 = vmul.f32 1.442695, %v2230_v35 }
0x111f   :  { %v2228_v37 = vpop.xlane.xlu0 %2227 }
0x1120   :  { %4480 = vpow2.f32 %v2234_v36  ;;  %v2231_v40 = vsub.f32 %v2217_v24, %v2228_v37 }
0x1122   :  { %v2236_v45 = vmul.f32 1.442695, %v2231_v40 }
0x1124   :  { %4482 = vpow2.f32 %v2236_v45 }
0x1126   :  { %v4479_v46 = vpop.eup %4478 }
0x1127   :  { %v2238_v48 = vsel %vm303_vm3, %v4479_v46, 0.0 }
0x1128   :  { %2239 = vadd.xlane.f32.xlu1 %v2238_v48 }
0x112a   :  { %v4481_v33 = vpop.eup %4480 }
0x112b   :  { %v2241_v52 = vsel %vm303_vm3, %v4481_v33, 0.0 }
0x112c   :  { %2242 = vadd.xlane.f32.xlu0 %v2241_v52 }
0x112e   :  { %v4483_v53 = vpop.eup %4482 }
0x112f   :  { %v2244_v54 = vsel %vm310_vm4, %v4483_v53, 0.0 }
0x1130   :  { %2245 = vadd.xlane.f32.xlu1 %v2244_v54 }
0x11b5   :  { %v2240_v56 = vpop.xlane.xlu1 %2239 }
0x11b6   :  { %4484 = vrcp.f32 %v2240_v56 }
0x11b9   :  { %v2243_v60 = vpop.xlane.xlu0 %2242 }
0x11ba   :  { %4486 = vrcp.f32 %v2243_v60 }
0x11bd   :  { %v2246_v42 = vpop.xlane.xlu1 %2245 }
0x11be   :  { %4488 = vrcp.f32 %v2246_v42 }
0x11c0   :  { %v4485_v61 = vpop.eup %4484 }
0x11c1   :  { %v2250_v63 = vmul.f32 %v4485_v61, %v4479_v46 }
0x11c3   :  { %4158 = vmatmul.mubr.msk.f32.vlgmr.msra.gmra.mrb[60].mxu0 %vm303_vm3, %v2250_v63 }
0x11c4   :  { %v4487_v0 = vpop.eup %4486  ;;  %4160 = vmatprep.mubr.msk.f32.mxu0 %vm4541_vm0, %v4542_v4  ;;  %4378 = vmatpush3.bf16.msra.mxu0 %v4377_v62 }
0x11c5   :  { %v2251_v31 = vmul.f32 %v4487_v0, %v4481_v33  ;;  %4181 = vmatprep.subr.mxu0 %v4542_v4 }
0x11c7   :  { %4161 = vmatmul.mubr.msk.f32.gmra.mrb[62].mxu0 %vm303_vm3, %v2251_v31 }
0x11c8   :  { %v4489_v3 = vpop.eup %4488  ;;  %4163 = vmatprep.mubr.msk.f32.mxu0 %vm4541_vm0, %v4542_v4  ;;  %4182 = vmatpush3.msk.msra.mxu0 %vm371_vm5, %v3618_v1 }
0x11c9   :  { %v2252_v6 = vmul.f32 %v4489_v3, %v4483_v53  ;;  %4382 = vmatprep.subr.bf16.mxu0 %v4540_v2 }
0x11cb   :  { %4164 = vmatmul.mubr.msk.f32.gmra.mrb[64].mxu0 %vm303_vm3, %v2252_v6 }
0x11cc   :  { %4183 = vmatprep.mubr.msk.f32.mxu0 %vm4541_vm0, %v4542_v4 }
0x11cf   :  { %4184 = vmatmul.mubr.msk.f32.vlgmr.msra.gmra.mrb[66].mxu0 %vm303_vm3, %v5135_v44 }
0x11d0   :  { %4186 = vmatprep.mubr.msk.f32.mxu0 %vm4541_vm0, %v4542_v4  ;;  %4384 = vmatpush3.bf16.msra.mxu0 %v4383_v8 }
0x11d1   :  { %4211 = vmatprep.subr.mxu0 %v4542_v4 }
0x11d3   :  { %4187 = vmatmul.mubr.msk.f32.gmra.mrb[68].mxu0 %vm303_vm3, %v5145_v50 }
0x11d4   :  { %4189 = vmatprep.mubr.msk.f32.mxu0 %vm4541_vm0, %v4542_v4  ;;  %4212 = vmatpush3.msk.msra.mxu0 %vm371_vm5, %v3632_v9 }
0x11d5   :  { %4389 = vmatprep.subr.bf16.mxu0 %v4540_v2 }
0x11d7   :  { %4190 = vmatmul.mubr.msk.f32.gmra.mrb[70].mxu0 %vm303_vm3, %v5159_v55 }
0x11d8   :  { %4213 = vmatprep.mubr.msk.f32.mxu0 %vm4541_vm0, %v4542_v4 }
0x11db   :  { %4214 = vmatmul.mubr.msk.f32.vlgmr.msra.gmra.mrb[72].mxu0 %vm303_vm3, %v5135_v44 }
0x11dc   :  { %4216 = vmatprep.mubr.msk.f32.mxu0 %vm4541_vm0, %v4542_v4 }
0x11df   :  { %4217 = vmatmul.mubr.msk.f32.gmra.mrb[74].mxu0 %vm303_vm3, %v5145_v50 }
0x11e0   :  { %4219 = vmatprep.mubr.msk.f32.mxu0 %vm4541_vm0, %v4542_v4 }
0x11e3   :  { %4220 = vmatmul.mubr.msk.f32.gmra.mrb[76].mxu0 %vm303_vm3, %v5159_v55 }
0x11e4   :  { %4243 = vmatprep.mubr.msk.f32.mxu0 %vm4541_vm0, %v4542_v4 }
0x1296   :  { %v2331_v47 = vpop.f32.mrb[60].mxu0 }
0x1297   :  { %v4159_v14 = vpop.f32.mrb[61].mxu0  ;;  %4169 = vmatmul.mubr.msk.f32.vlgmr.msra.gmra.mrb[54].mxu1 %vm627_vm6, %v2331_v47  ;;  %v3647_v47 = vld [vmem:[%s5477_s8 + $0x18] sm:$0xff] }
0x1298   :  { %4171 = vmatprep.mubr.msk.f32.mxu1 %vm4541_vm0, %v4542_v4  ;;  %4381 = vmatpush3.bf16.msra.mxu1 %v4380_v13 }
0x1299   :  { %4196 = vmatprep.subr.mxu1 %v4542_v4 }
0x129a   :  { %v2336_v17 = vpop.f32.mrb[62].mxu0 }
0x129b   :  { %v4162_v18 = vpop.f32.mrb[63].mxu0  ;;  %4172 = vmatmul.mubr.msk.f32.gmra.mrb[56].mxu1 %vm627_vm6, %v2336_v17 }
0x129c   :  { %4174 = vmatprep.mubr.msk.f32.mxu1 %vm4541_vm0, %v4542_v4  ;;  %4197 = vmatpush3.msk.msra.mxu1 %vm371_vm5, %v3625_v15 }
0x129d   :  { %4385 = vmatprep.subr.bf16.mxu1 %v4540_v2 }
0x129e   :  { %v2341_v12 = vpop.f32.mrb[64].mxu0 }
0x129f   :  { %v4165_v21 = vpop.f32.mrb[65].mxu0  ;;  %4175 = vmatmul.mubr.msk.f32.gmra.mrb[58].mxu1 %vm627_vm6, %v2341_v12 }
0x12a0   :  { %4198 = vmatprep.mubr.msk.f32.mxu1 %vm4541_vm0, %v4542_v4 }
0x12a2   :  { %v2512_v22 = vpop.f32.mrb[66].mxu0 }
0x12a3   :  { %v4185_v24 = vpop.f32.mrb[67].mxu0  ;;  %4199 = vmatmul.mubr.msk.f32.vlgmr.msra.gmra.mrb[60].mxu1 %vm303_vm3, %v5135_v44 }
0x12a4   :  { %4201 = vmatprep.mubr.msk.f32.mxu1 %vm4541_vm0, %v4542_v4 }
0x12a6   :  { %v2517_v25 = vpop.f32.mrb[68].mxu0 }
0x12a7   :  { %v4188_v27 = vpop.f32.mrb[69].mxu0  ;;  %4202 = vmatmul.mubr.msk.f32.gmra.mrb[62].mxu1 %vm303_vm3, %v5145_v50 }
0x12a8   :  { %4204 = vmatprep.mubr.msk.f32.mxu1 %vm4541_vm0, %v4542_v4 }
0x12aa   :  { %v2522_v28 = vpop.f32.mrb[70].mxu0 }
0x12ab   :  { %v4191_v29 = vpop.f32.mrb[71].mxu0  ;;  %4205 = vmatmul.mubr.msk.f32.gmra.mrb[64].mxu1 %vm303_vm3, %v5159_v55 }
0x12ac   :  { %4228 = vmatprep.mubr.msk.f32.mxu1 %vm4541_vm0, %v4542_v4 }
0x12ae   :  { %v2686_v44 = vpop.f32.mrb[72].mxu0 }
0x12af   :  { %v4215_v30 = vpop.f32.mrb[73].mxu0 }
0x12b2   :  { %v2691_v34 = vpop.f32.mrb[74].mxu0 }
0x12b3   :  { %v4390_v35 = vpack.c.bf16 %v2691_v34, %v2686_v44  ;;  %v4218_v36 = vpop.f32.mrb[75].mxu0 }
0x12b5   :  { %4391 = vmatpush3.bf16.msra.mxu0 %v4390_v35 }
0x12b6   :  { %v2696_v37 = vpop.f32.mrb[76].mxu0  ;;  %4241 = vmatprep.subr.mxu0 %v4542_v4 }
0x12b7   :  { %v4221_v50 = vpop.f32.mrb[77].mxu0 }
0x12b9   :  { %4242 = vmatpush3.msk.msra.mxu0 %vm371_vm5, %v2696_v37 }
0x12ba   :  { %4392 = vmatprep.subr.bf16.mxu0 %v4540_v2 }
0x1376   :  { %v2599_v40 = vpop.f32.mrb[60].mxu1 }
0x1377   :  { %v4200_v45 = vpop.f32.mrb[61].mxu1 }
0x137a   :  { %v2604_v55 = vpop.f32.mrb[62].mxu1 }
0x137b   :  { %v4386_v46 = vpack.c.bf16 %v2604_v55, %v2599_v40  ;;  %v4203_v48 = vpop.f32.mrb[63].mxu1 }
0x137d   :  { %4388 = vmatpush3.bf16.xpose.msk.msra.mxu1 %vm4814_vm7, %v4386_v46 }
0x137e   :  { %v2609_v33 = vpop.f32.mrb[64].mxu1  ;;  %4226 = vmatprep.subr.mxu1 %v4542_v4 }
0x137f   :  { %v4206_v52 = vpop.f32.mrb[65].mxu1 }
0x1385   :  { %4227 = vmatpush3.xpose.msk.msra.mxu1 %vm627_vm6, %v2609_v33 }
0x1386   :  { %4252 = vmatprep.subr.mxu1 %v4542_v4 }
0x1388   :  { %4229 = vmatmul.mubr.msk.f32.vlgmr.msra.gmra.mrb[66].mxu1 %vm627_vm6, %v2512_v22 }
0x1389   :  { %4231 = vmatprep.mubr.msk.f32.mxu1 %vm4541_vm0, %v4542_v4  ;;  %4253 = vmatpush3.msra.mxu1 %v3647_v47 }
0x138a   :  { %4395 = vmatprep.subr.bf16.mxu1 %v4540_v2 }
0x138c   :  { %4232 = vmatmul.mubr.msk.f32.gmra.mrb[68].mxu1 %vm627_vm6, %v2517_v25 }
0x138d   :  { %4234 = vmatprep.mubr.msk.f32.mxu1 %vm4541_vm0, %v4542_v4 }
0x1390   :  { %4235 = vmatmul.mubr.msk.f32.gmra.mrb[70].mxu1 %vm627_vm6, %v2522_v28 }
0x1391   :  { %4254 = vmatprep.mubr.msk.f32.mxu1 %vm4541_vm0, %v4542_v4 }
0x145b   :  { %v2784_v51 = vpop.f32.mrb[66].mxu1 }
0x145c   :  { %v2785_v53 = vadd.f32 %v2784_v51, %v4844_v26  ;;  %v4230_v54 = vpop.f32.mrb[67].mxu1 }
0x145e   :  { %v2798_v38 = vsel %vm303_vm3, %v2785_v53, -inf }
0x145f   :  { %2799 = vmax.xlane.f32.xlu0 %v2798_v38  ;;  %v2789_v56 = vpop.f32.mrb[68].mxu1 }
0x1460   :  { %v2790_v60 = vadd.f32 %v2789_v56, %v4848_v32  ;;  %v4233_v42 = vpop.f32.mrb[69].mxu1 }
0x1462   :  { %v2801_v58 = vsel %vm303_vm3, %v2790_v60, -inf }
0x1463   :  { %2802 = vmax.xlane.f32.xlu1 %v2801_v58  ;;  %v2794_v59 = vpop.f32.mrb[70].mxu1 }
0x1464   :  { %v2795_v61 = vadd.f32 %v2794_v59, %v4853_v39  ;;  %v4236_v62 = vpop.f32.mrb[71].mxu1 }
0x1466   :  { %v2804_v63 = vsel %vm310_vm4, %v2795_v61, -inf }
0x1467   :  { %2805 = vmax.xlane.f32.xlu0 %v2804_v63 }
0x14ec   :  { %v2800_v0 = vpop.xlane.xlu0 %2799 }
0x14ed   :  { %v2807_v26 = vsub.f32 %v2785_v53, %v2800_v0 }
0x14ef   :  { %v2810_v31 = vmul.f32 1.442695, %v2807_v26  ;;  %v3652_v26 = vld [vmem:[%s5479_s10 + $0x18] sm:$0xff] }
0x14f0   :  { %v2803_v1 = vpop.xlane.xlu1 %2802 }
0x14f1   :  { %4490 = vpow2.f32 %v2810_v31  ;;  %v2808_v3 = vsub.f32 %v2790_v60, %v2803_v1  ;;  %v3653_v31 = vld [vmem:[%s5479_s10 + $0x20] sm:$0xff] }
0x14f2   :  { %v4393_v1 = vpack.c.bf16 %v3653_v31, %v3652_v26 }
0x14f3   :  { %v2812_v6 = vmul.f32 1.442695, %v2808_v3  ;;  %v3654_v3 = vld [vmem:[%s5479_s10 + $0x28] sm:$0xf] }
0x14f4   :  { %v2806_v7 = vpop.xlane.xlu0 %2805 }
0x14f5   :  { %4492 = vpow2.f32 %v2812_v6  ;;  %v2809_v32 = vsub.f32 %v2795_v61, %v2806_v7 }
0x14f7   :  { %v2814_v43 = vmul.f32 1.442695, %v2809_v32 }
0x14f9   :  { %4494 = vpow2.f32 %v2814_v43 }
0x14fb   :  { %v4491_v8 = vpop.eup %4490 }
0x14fc   :  { %v2816_v9 = vsel %vm303_vm3, %v4491_v8, 0.0 }
0x14fd   :  { %2817 = vadd.xlane.f32.xlu1 %v2816_v9 }
0x14ff   :  { %v4493_v39 = vpop.eup %4492 }
0x1500   :  { %v2819_v10 = vsel %vm303_vm3, %v4493_v39, 0.0 }
0x1501   :  { %2820 = vadd.xlane.f32.xlu0 %v2819_v10 }
0x1503   :  { %v4495_v11 = vpop.eup %4494 }
0x1504   :  { %v2822_v13 = vsel %vm310_vm4, %v4495_v11, 0.0 }
0x1505   :  { %2823 = vadd.xlane.f32.xlu1 %v2822_v13 }
0x158a   :  { %v2818_v14 = vpop.xlane.xlu1 %2817 }
0x158b   :  { %4496 = vrcp.f32 %v2818_v14 }
0x158e   :  { %v2821_v15 = vpop.xlane.xlu0 %2820 }
0x158f   :  { %4498 = vrcp.f32 %v2821_v15 }
0x1592   :  { %v2824_v17 = vpop.xlane.xlu1 %2823 }
0x1593   :  { %4500 = vrcp.f32 %v2824_v17 }
0x1595   :  { %v4497_v18 = vpop.eup %4496 }
0x1596   :  { %v2828_v12 = vmul.f32 %v4497_v18, %v4491_v8 }
0x1598   :  { %4244 = vmatmul.mubr.msk.f32.vlgmr.msra.gmra.mrb[78].mxu0 %vm303_vm3, %v2828_v12 }
0x1599   :  { %v4499_v21 = vpop.eup %4498  ;;  %4246 = vmatprep.mubr.msk.f32.mxu0 %vm4541_vm0, %v4542_v4  ;;  %4394 = vmatpush3.bf16.msra.mxu0 %v4393_v1 }
0x159a   :  { %v2829_v22 = vmul.f32 %v4499_v21, %v4493_v39  ;;  %4267 = vmatprep.subr.mxu0 %v4542_v4 }
0x159c   :  { %4247 = vmatmul.mubr.msk.f32.gmra.mrb[80].mxu0 %vm303_vm3, %v2829_v22 }
0x159d   :  { %v4501_v24 = vpop.eup %4500  ;;  %4249 = vmatprep.mubr.msk.f32.mxu0 %vm4541_vm0, %v4542_v4  ;;  %4268 = vmatpush3.msk.msra.mxu0 %vm371_vm5, %v3654_v3 }
0x159e   :  { %v2830_v25 = vmul.f32 %v4501_v24, %v4495_v11  ;;  %4401 = vmatprep.subr.bf16.mxu0 %v4540_v2  ;;  %v3651_v11 = vld [vmem:[%s5478_s9 + $0x2] sm:$0x3] }
0x159f   :  { %v3061_v47 = vrot.slane %v3651_v11, %v4748_v20  ;;  %v3068_v15 = vrot.slane %v3651_v11, %v4754_v23 }
0x15a0   :  { %4250 = vmatmul.mubr.msk.f32.gmra.mrb[82].mxu0 %vm303_vm3, %v2830_v25 }
0x15a1   :  { %4269 = vmatprep.mubr.msk.f32.mxu0 %vm4541_vm0, %v4542_v4 }
0x166b   :  { %v2909_v27 = vpop.f32.mrb[78].mxu0 }
0x166c   :  { %v4245_v28 = vpop.f32.mrb[79].mxu0  ;;  %4255 = vmatmul.mubr.msk.f32.vlgmr.msra.gmra.mrb[54].mxu1 %vm627_vm6, %v2909_v27 }
0x166d   :  { %4257 = vmatprep.mubr.msk.f32.mxu1 %vm4541_vm0, %v4542_v4 }
0x166f   :  { %v2914_v29 = vpop.f32.mrb[80].mxu0 }
0x1670   :  { %v4248_v44 = vpop.f32.mrb[81].mxu0  ;;  %4258 = vmatmul.mubr.msk.f32.gmra.mrb[56].mxu1 %vm627_vm6, %v2914_v29 }
0x1671   :  { %4260 = vmatprep.mubr.msk.f32.mxu1 %vm4541_vm0, %v4542_v4 }
0x1673   :  { %v2919_v30 = vpop.f32.mrb[82].mxu0 }
0x1674   :  { %v4251_v34 = vpop.f32.mrb[83].mxu0  ;;  %4261 = vmatmul.mubr.msk.f32.gmra.mrb[58].mxu1 %vm627_vm6, %v2919_v30  ;;  %v3661_v30 = vld [vmem:[%s5481_s12 + $0x20] sm:$0xff] }
0x1675   :  { %4286 = vmatprep.mubr.msk.f32.mxu1 %vm4541_vm0, %v4542_v4  ;;  %v3662_v34 = vld [vmem:[%s5481_s12 + $0x28] sm:$0xff] }
0x173f   :  { %v3000_v35 = vpop.f32.mrb[54].mxu1 }
0x1740   :  { %v5352_v36 = vadd.f32 %v3000_v35, %v5080_v41  ;;  %v4256_v37 = vpop.f32.mrb[55].mxu1  ;;  %v4396_v35 = vpack.c.bf16 %v3662_v34, %v3661_v30  ;;  %v3372_v30 = vld [vmem:[%s5483_s14] sm:$0x3]  ;;  %s4516_s14 = scalar_lea.vmem %s3492_s20, 32 }
0x1741   :  { %v3663_v37 = vld [vmem:[%s5481_s12 + $0x30] sm:$0xff]  ;;  %v3390_v34 = vrot.slane %v3372_v30, %v4748_v20  ;;  %p4517_p0 = scmp.ne.s32.totalorder %s3492_s20, %s4516_s14  ;;  %p4522_p2 = scmp.lt.s32.totalorder %s4516_s14, %s4516_s14 }
0x1742   :  { %v3019_v50 = vsel %vm303_vm3, %v5352_v36, 0.0  ;;  %4397 = vmatpush3.bf16.msra.mxu1 %v4396_v35 }
0x1743   :  { %3020 = vadd.xlane.f32.xlu0 %v3019_v50  ;;  %v3005_v40 = vpop.f32.mrb[56].mxu1  ;;  %4398 = vmatprep.subr.bf16.mxu1 %v4540_v2  ;;  %v3664_v50 = vld [vmem:[%s5481_s12 + $0x38] sm:$0xff]  ;;  %p4523_p3 = por %p4522_p2, %p4521_p1 }
0x1744   :  { %v5357_v45 = vadd.f32 %v3005_v40, %v5085_v49  ;;  %v4259_v55 = vpop.f32.mrb[57].mxu1  ;;  %v4399_v40 = vpack.c.bf16 %v3664_v50, %v3663_v37  ;;  %v3395_v37 = vrot.slane %v3372_v30, %v4754_v23 }
0x1745   :  { %v3656_v55 = vld [vmem:[%s5480_s11 + $0x1] ss:$0 sm:$0xff]  ;;  %p4524_p4 = pnand %p4523_p3, %p4517_p0 }
0x1746   :  { %v3022_v46 = vsel %vm303_vm3, %v5357_v45, 0.0  ;;  %4400 = vmatpush3.bf16.msra.mxu1 %v4399_v40 }
0x1747   :  { %3023 = vadd.xlane.f32.xlu1 %v3022_v46  ;;  %v3010_v48 = vpop.f32.mrb[58].mxu1  ;;  %4404 = vmatprep.subr.bf16.mxu1 %v4540_v2 }
0x1748   :  { %v5362_v33 = vadd.f32 %v3010_v48, %v5090_v57  ;;  %v4262_v41 = vpop.f32.mrb[59].mxu1 }
0x174a   :  { %v3025_v52 = vsel %vm310_vm4, %v5362_v33, 0.0 }
0x174b   :  { %3026 = vadd.xlane.f32.xlu0 %v3025_v52 }
0x17d0   :  { %v3021_v51 = vpop.xlane.xlu0 %3020 }
0x17d1   :  { %v3028_v53 = vmul.f32 0.05, %v3021_v51 }
0x17d3   :  { %v3031_v54 = vsub.f32 %v5352_v36, %v3028_v53 }
0x17d4   :  { %v3024_v49 = vpop.xlane.xlu1 %3023 }
0x17d5   :  { %v3029_v38 = vmul.f32 0.05, %v3024_v49  ;;  %v3034_v56 = vmul.f32 %v3031_v54, %v3031_v54 }
0x17d7   :  { %v3032_v60 = vsub.f32 %v5357_v45, %v3029_v38  ;;  %v3037_v42 = vsel %vm303_vm3, %v3034_v56, 0.0 }
0x17d8   :  { %3038 = vadd.xlane.f32.xlu1 %v3037_v42  ;;  %v3027_v58 = vpop.xlane.xlu0 %3026 }
0x17d9   :  { %v3030_v57 = vmul.f32 0.05, %v3027_v58  ;;  %v3035_v59 = vmul.f32 %v3032_v60, %v3032_v60 }
0x17db   :  { %v3033_v61 = vsub.f32 %v5362_v33, %v3030_v57  ;;  %v3040_v62 = vsel %vm303_vm3, %v3035_v59, 0.0 }
0x17dc   :  { %3041 = vadd.xlane.f32.xlu0 %v3040_v62 }
0x17dd   :  { %v3036_v63 = vmul.f32 %v3033_v61, %v3033_v61 }
0x17df   :  { %v3043_v0 = vsel %vm310_vm4, %v3036_v63, 0.0 }
0x17e0   :  { %3044 = vadd.xlane.f32.xlu1 %v3043_v0 }
0x1865   :  { %v3039_v6 = vpop.xlane.xlu1 %3038 }
0x1866   :  { %v3046_v7 = vmul.f32 0.05, %v3039_v6  ;;  %v3666_v6 = vld [vmem:[%s5482_s13 + $0x1] ss:$0 sm:$0xff] }
0x1868   :  { %v3049_v32 = vadd.f32 1e-05, %v3046_v7 }
0x1869   :  { %v3042_v43 = vpop.xlane.xlu0 %3041 }
0x186a   :  { %4502 = vrsqrt.f32 %v3049_v32  ;;  %v3047_v8 = vmul.f32 0.05, %v3042_v43 }
0x186c   :  { %v3050_v9 = vadd.f32 1e-05, %v3047_v8 }
0x186d   :  { %v3045_v39 = vpop.xlane.xlu1 %3044 }
0x186e   :  { %4504 = vrsqrt.f32 %v3050_v9  ;;  %v3048_v10 = vmul.f32 0.05, %v3045_v39 }
0x1870   :  { %v3051_v13 = vadd.f32 1e-05, %v3048_v10 }
0x1872   :  { %4506 = vrsqrt.f32 %v3051_v13 }
0x1874   :  { %v4503_v14 = vpop.eup %4502 }
0x1875   :  { %v3055_v17 = vmul.f32 %v4503_v14, %v3031_v54 }
0x1877   :  { %v3062_v18 = vmul.f32 %v3061_v47, %v3055_v17 }
0x1878   :  { %v4505_v12 = vpop.eup %4504 }
0x1879   :  { %v3069_v21 = vadd.f32 %v3068_v15, %v3062_v18  ;;  %v3056_v22 = vmul.f32 %v4505_v12, %v3032_v60  ;;  %v86_v18 = vsel %vm85_vm12, 0.1, %v4542_v4 }
0x187b   :  { %4270 = vmatmul.mubr.msk.f32.vlgmr.msra.gmra.mrb[84].mxu0 %vm303_vm3, %v3069_v21  ;;  %v3063_v24 = vmul.f32 %v3061_v47, %v3056_v22 }
0x187c   :  { %v4507_v25 = vpop.eup %4506  ;;  %4272 = vmatprep.mubr.msk.f32.mxu0 %vm4541_vm0, %v4542_v4 }
0x187d   :  { %v3070_v27 = vadd.f32 %v3068_v15, %v3063_v24  ;;  %v3057_v28 = vmul.f32 %v4507_v25, %v3033_v61  ;;  %v3398_v24 = vld [vmem:[%s5484_s15 + $0x8] sm:$0xff] }
0x187f   :  { %4273 = vmatmul.mubr.msk.f32.gmra.mrb[86].mxu0 %vm303_vm3, %v3070_v27  ;;  %v3064_v29 = vmul.f32 %v3061_v47, %v3057_v28  ;;  %v3399_v27 = vld [vmem:[%s5484_s15 + $0x10] sm:$0xf] }
0x1880   :  { %4275 = vmatprep.mubr.msk.f32.mxu0 %vm4541_vm0, %v4542_v4 }
0x1881   :  { %v3071_v44 = vadd.f32 %v3068_v15, %v3064_v29 }
0x1883   :  { %4276 = vmatmul.mubr.msk.f32.gmra.mrb[88].mxu0 %vm303_vm3, %v3071_v44 }
0x1884   :  { %4301 = vmatprep.mubr.msk.f32.mxu0 %vm4541_vm0, %v4542_v4 }
0x194e   :  { %v3162_v46 = vpop.f32.mrb[84].mxu0 }
0x194f   :  { %v3163_v48 = vadd.f32 %v3656_v55, %v3162_v46  ;;  %v4271_v41 = vpop.f32.mrb[85].mxu0 }
0x1951   :  { %v3179_v52 = vmul.f32 0.70710677, %v3163_v48  ;;  %v3176_v58 = vmul.f32 0.5, %v3163_v48 }
0x1952   :  { %v3167_v51 = vpop.f32.mrb[86].mxu0 }
0x1953   :  { %4508 = verf.f32 %v3179_v52  ;;  %v3168_v53 = vadd.f32 %v3656_v55, %v3167_v51  ;;  %v4274_v54 = vpop.f32.mrb[87].mxu0 }
0x1955   :  { %v3180_v49 = vmul.f32 0.70710677, %v3168_v53  ;;  %v3177_v62 = vmul.f32 0.5, %v3168_v53 }
0x1956   :  { %v3172_v38 = vpop.f32.mrb[88].mxu0 }
0x1957   :  { %4510 = verf.f32 %v3180_v49  ;;  %v3173_v56 = vadd.f32 %v3656_v55, %v3172_v38  ;;  %v4277_v60 = vpop.f32.mrb[89].mxu0  ;;  %v3672_v55 = vld [vmem:[%s5485_s16] ss:$0 sm:$0xff] }
0x1959   :  { %v3181_v42 = vmul.f32 0.70710677, %v3173_v56  ;;  %v3178_v31 = vmul.f32 0.5, %v3173_v56 }
0x195b   :  { %4512 = verf.f32 %v3181_v42 }
0x195d   :  { %v4509_v2 = vpop.eup %4508 }
0x195e   :  { %v3185_v57 = vadd.f32 1.0, %v4509_v2 }
0x1960   :  { %v3188_v59 = vmul.f32 %v3185_v57, %v3176_v58 }
0x1961   :  { %v4511_v61 = vpop.eup %4510 }
0x1962   :  { %v3186_v63 = vadd.f32 1.0, %v4511_v61  ;;  %4287 = vmatmul.mubr.msk.f32.vlgmr.msra.gmra.mrb[72].mxu1 %vm1704_vm11, %v3188_v59 }
0x1963   :  { %4289 = vmatprep.mubr.msk.f32.mxu1 %vm4541_vm0, %v4542_v4 }
0x1964   :  { %v3189_v0 = vmul.f32 %v3186_v63, %v3177_v62 }
0x1965   :  { %v4513_v26 = vpop.eup %4512 }
0x1966   :  { %v3187_v1 = vadd.f32 1.0, %v4513_v26  ;;  %4290 = vmatmul.mubr.msk.f32.gmra.mrb[74].mxu1 %vm1704_vm11, %v3189_v0 }
0x1967   :  { %4292 = vmatprep.mubr.msk.f32.mxu1 %vm4541_vm0, %v4542_v4 }
0x1968   :  { %v3190_v3 = vmul.f32 %v3187_v1, %v3178_v31 }
0x196a   :  { %4293 = vmatmul.mubr.msk.f32.gmra.mrb[76].mxu1 %vm1704_vm11, %v3190_v3 }
0x196b   :  { %4310 = vmatprep.mubr.msk.f32.mxu1 %vm4541_vm0, %v4542_v4 }
0x1a35   :  { %v3279_v7 = vpop.f32.mrb[72].mxu1 }
0x1a36   :  { %v4288_v32 = vpop.f32.mrb[73].mxu1  ;;  %v3280_v43 = vadd.f32 %v3666_v6, %v3279_v7 }
0x1a38   :  { %v3293_v10 = vadd.f32 %v5352_v36, %v3280_v43 }
0x1a39   :  { %v3284_v8 = vpop.f32.mrb[74].mxu1 }
0x1a3a   :  { %v3285_v9 = vadd.f32 %v3666_v6, %v3284_v8  ;;  %v4291_v39 = vpop.f32.mrb[75].mxu1 }
0x1a3c   :  { %v3294_v11 = vadd.f32 %v5357_v45, %v3285_v9 }
0x1a3d   :  { %v3289_v13 = vpop.f32.mrb[76].mxu1 }
0x1a3e   :  { %v4402_v47 = vpack.c.bf16 %v3294_v11, %v3293_v10  ;;  %v3290_v14 = vadd.f32 %v3666_v6, %v3289_v13  ;;  %v4294_v15 = vpop.f32.mrb[77].mxu1 }
0x1a40   :  { %4403 = vmatpush3.bf16.msra.mxu0 %v4402_v47  ;;  %v3295_v17 = vadd.f32 %v5362_v33, %v3290_v14  ;;  %v3397_v33 = vld [vmem:[%s5484_s15] sm:$0xff] }
0x1a41   :  { %4299 = vmatprep.subr.mxu0 %v4542_v4  ;;  %v4405_v25 = vpack.c.bf16 %v3398_v24, %v3397_v33 }
0x1a43   :  { %4406 = vmatpush3.bf16.msra.mxu1 %v4405_v25 }
0x1a44   :  { %4300 = vmatpush3.msk.msra.mxu0 %vm371_vm5, %v3295_v17  ;;  %4308 = vmatprep.subr.mxu1 %v4542_v4 }
0x1a45   :  { %4302 = vmatmul.mubr.msk.f32.vlgmr.msra.gmra.mrb[90].mxu0 %vm303_vm3, %v86_v18 }
0x1a47   :  { %4309 = vmatpush3.msk.msra.mxu1 %vm371_vm5, %v3399_v27 }
0x1b18   :  { %v3368_v36 = vpop.f32.mrb[90].mxu0 }
0x1b19   :  { %v3374_v45 = vsel %vm3373_vm13, %v3368_v36, 0.0  ;;  %v4303_v12 = vpop.f32.mrb[91].mxu0 }
0x1b1a   :  { %3375 = vadd.xlane.f32.xlu0 %v3374_v45 }
0x1ba7   :  { %v3376_v21 = vpop.xlane.xlu0 %3375 }
0x1ba8   :  { %v3377_v22 = vmul.f32 0.05, %v3376_v21 }
0x1baa   :  { %v3378_v16 = vsub.f32 %v3368_v36, %v3377_v22 }
0x1bac   :  { %v3379_v5 = vmul.f32 %v3378_v16, %v3378_v16 }
0x1bae   :  { %v3380_v19 = vsel %vm3373_vm13, %v3379_v5, 0.0 }
0x1baf   :  { %3381 = vadd.xlane.f32.xlu1 %v3380_v19 }
0x1c3c   :  { %v3382_v28 = vpop.xlane.xlu1 %3381 }
0x1c3d   :  { %v3383_v29 = vmul.f32 0.05, %v3382_v28 }
0x1c3f   :  { %v3384_v44 = vadd.f32 1e-05, %v3383_v29 }
0x1c41   :  { %4514 = vrsqrt.f32 %v3384_v44 }
0x1c4b   :  { %v4515_v35 = vpop.eup %4514 }
0x1c4c   :  { %v3386_v4 = vmul.f32 %v4515_v35, %v3378_v16 }
0x1c4e   :  { %v3391_v50 = vmul.f32 %v3390_v34, %v3386_v4 }
0x1c50   :  { %v3396_v40 = vadd.f32 %v3395_v37, %v3391_v50 }
0x1c52   :  { %4311 = vmatmul.mubr.msk.f32.vlgmr.msra.gmra.mrb[78].mxu1 %vm303_vm3, %v3396_v40 }
0x1d25   :  { %v3479_v46 = vpop.f32.mrb[78].mxu1 }
0x1d26   :  { %v3480_v48 = vadd.f32 %v3672_v55, %v3479_v46  ;;  %v4312_v41 = vpop.f32.mrb[79].mxu1 }
0x1d28   :  { %3484 = vst.msk [vmem:[#allocation2] sm:$0x3] %vm3483_vm14, %v3480_v48 }
0x1d29   :  { %4527 = shalt.err (!%p4524_p4)
}
0x1d2a   :  { %s4528_s22 = scalar_lea.hbm %s5486_s17, 32 }
0x1d2b   :  { %p4529_p5 = scmp.ne.s32.totalorder %s5486_s17, %s4528_s22  ;;  %p4532_p6 = scmp.lt.u32.totalorder %s4528_s22, %s5486_s17 }
0x1d2d   :  { %p4534_p7 = pnand %p4532_p6, %p4529_p5 }
0x1d2f   :  { %4537 = shalt.err (!%p4534_p7)
}
0x1d30   :  { %3494 = dma.vmem_to_hbm [thread:$0]  %s3492_s20, 32, %s5486_s17, [#allocation3]  }
0x1d31   :  { %4538 = dma.done.wait [#allocation3], 32  }
0x1d32   :  { %4539 = vsyncadd [#allocation3], 4294967264 }
0x1d33   :  { %3498 = vsyncpa [#allocation3], 1 }

</bundles_post_ra>
